<compile_context>
chip_gen: v5e
topology: v5e:2x2
jax: 0.10.0
libtpu: 0.0.40
codegen_flags: <defaults>
</compile_context>

<pallas_src>
import jax
import jax.numpy as jnp
import numpy as np
from jax.experimental import pallas as pl
from jax.experimental.pallas import tpu as pltpu


def basic_block_kernel(x_ref, w1_ref, b1_ref, w2_ref, b2_ref, o_ref):
    bt, seq, cp = x_ref.shape
    m = bt * seq
    x = x_ref[...]                                         # (bt, seq, cp) bf16

    def conv3_fused(h, w_ref):
        # k=3 "same" conv as ONE K-stacked MXU call:
        #   out[l] = h[l-1] @ W0 + h[l] @ W1 + h[l+1] @ W2   (zero padded)
        # Shifted taps are built per-sample in bf16 with exact zero boundary
        # rows, concatenated along the contraction dim -> (m, 3*cp), then a
        # single (m, 3cp) @ (3cp, cp) dot keeps only ONE f32 accumulator live.
        zero = jnp.zeros((bt, 1, cp), h.dtype)
        h_prev = jnp.concatenate([zero, h[:, :seq - 1, :]], axis=1)
        h_next = jnp.concatenate([h[:, 1:, :], zero], axis=1)
        stacked = jnp.concatenate([h_prev, h, h_next], axis=2).reshape(m, 3 * cp)
        return jnp.dot(stacked, w_ref[...], preferred_element_type=jnp.float32)

    # conv1 (BN1 scale pre-folded into w1) -> bias -> relu      (f32 epilogue)
    h = jnp.maximum(conv3_fused(x, w1_ref) + b1_ref[...], 0.0)
    h = h.astype(jnp.bfloat16).reshape(bt, seq, cp)
    # conv2 (BN2 scale pre-folded into w2) -> bias -> residual -> relu
    y = conv3_fused(h, w2_ref) + b2_ref[...] + x.reshape(m, cp).astype(jnp.float32)
    o_ref[...] = jnp.maximum(y, 0.0).astype(o_ref.dtype).reshape(bt, seq, cp)


def _tpu_generation():
    """(vmem_capacity_bytes, num_tensorcores) with conservative fallbacks."""
    vmem_cap = None
    try:
        vmem_cap = int(pltpu.get_tpu_info().vmem_capacity_bytes)
    except Exception:
        pass
    num_tc = 1
    try:
        kind = jax.devices()[0].device_kind.lower()
        if "v7" in kind or "7x" in kind:
            num_tc = 2
    except Exception:
        pass
    if vmem_cap is None:
        vmem_cap = 64 * 2 ** 20            # safe floor for every generation
    return vmem_cap, num_tc


def _pick_block_batch(n, seq_len, num_tc, max_rows):
    """Largest per-step batch block whose bt*L rows fit max_rows.  On 2-TC
    chips prefer a step count that is a multiple of num_tc so both cores stay
    fed; on single-TC chips the grid is a serial loop, so bigger blocks win."""
    candidates = [d for d in range(1, n + 1)
                  if n % d == 0 and d * seq_len <= max_rows]
    if not candidates:
        return 1   # TODO(synk): L-tiling with a 1-row conv halo for very long L.
    if num_tc > 1:
        even = [d for d in candidates if (n // d) % num_tc == 0]
        if even:
            return max(even)
    return max(candidates)


def fold_bn_conv_params(w1, bn1, w2, bn2, C, cp, eps):
    """Host-side prep: fold eval-mode BN scale into the conv weights, K-stack
    the (Cout,Cin,3) weights into (3*Cp, Cp) bf16 contraction matrices, keep
    the BN bias as an f32 (1, Cp) row."""
    g1, be1, m1, v1 = bn1
    g2, be2, m2, v2 = bn2
    s1 = g1 / jnp.sqrt(v1 + eps)
    s2 = g2 / jnp.sqrt(v2 + eps)
    bb1 = be1 - m1 * s1
    bb2 = be2 - m2 * s2

    def prep_w(w_oik, scale):
        w = w_oik * scale[:, None, None]               # fold BN scale (f32)
        w = jnp.transpose(w, (2, 1, 0))                # (K, Cin, Cout)
        w = jnp.pad(w, ((0, 0), (0, cp - C), (0, cp - C)))
        return w.reshape(3 * cp, cp).astype(jnp.bfloat16)   # K-stacked

    b1p = jnp.pad(bb1, (0, cp - C)).reshape(1, cp).astype(jnp.float32)
    b2p = jnp.pad(bb2, (0, cp - C)).reshape(1, cp).astype(jnp.float32)
    return prep_w(w1, s1), b1p, prep_w(w2, s2), b2p


def basic_block_pallas_nlc(x_nlc, w1p, b1p, w2p, b2p):
    """Core entry point: padded channels-last bf16 activations (N, L, Cp) in,
    (N, L, Cp) bf16 out.  Stacked ResNet blocks should chain this directly so
    activations stay in padded-NLC bf16 between blocks (no per-block
    transpose/pad/slice HBM round trips)."""
    N, L, cp = x_nlc.shape

    vmem_cap, num_tc = _tpu_generation()
    # Leave headroom below the physical cap: ~48 MiB on 64-MiB (v7x-class)
    # chips, ~96 MiB on 128-MiB (v5e/v6e) chips.
    vmem_budget = 48 * 2 ** 20 if vmem_cap <= 64 * 2 ** 20 else 96 * 2 ** 20

    # Explicit per-row live-byte count for the K-stacked form:
    #   pipelined x/out blocks (bf16, double-buffered): 2*2*cp*2 = 8*cp
    #   stacked bf16 taps (m,3cp) + 2 shifted copies:   6*cp + 4*cp
    #   f32 conv acc + f32 h + bf16 h + f32 y:          4*cp + 4*cp + 2*cp + 4*cp
    row_bytes = 32 * cp
    weight_bytes = 2 * (3 * cp) * cp * 2 + 2 * cp * 4   # single-buffered w1,w2,b1,b2
    max_rows = max(1, (vmem_budget - weight_bytes) // row_bytes)
    max_rows = min(max_rows, 4096)                       # pipelining sweet spot

    bt = _pick_block_batch(N, L, num_tc, max_rows)
    grid = (N // bt,)

    def build(single_buffer_weights):
        wkw = dict(pipeline_mode=pl.Buffered(1)) if single_buffer_weights else {}
        return pl.pallas_call(
            basic_block_kernel,
            out_shape=jax.ShapeDtypeStruct((N, L, cp), jnp.bfloat16),
            grid_spec=pltpu.PrefetchScalarGridSpec(
                num_scalar_prefetch=0,
                grid=grid,
                in_specs=[
                    pl.BlockSpec((bt, L, cp), lambda n: (n, 0, 0)),       # x block
                    pl.BlockSpec((3 * cp, cp), lambda n: (0, 0), **wkw),  # w1 (K-stacked)
                    pl.BlockSpec((1, cp), lambda n: (0, 0), **wkw),       # bn1 bias
                    pl.BlockSpec((3 * cp, cp), lambda n: (0, 0), **wkw),  # w2 (K-stacked)
                    pl.BlockSpec((1, cp), lambda n: (0, 0), **wkw),       # bn2 bias
                ],
                out_specs=pl.BlockSpec((bt, L, cp), lambda n: (n, 0, 0)),
            ),
            compiler_params=pltpu.CompilerParams(
                dimension_semantics=("parallel",),
                vmem_limit_bytes=int(vmem_budget),
            ),
        )

    try:
        # Invariant weights/biases single-buffered (halves their VMEM use).
        return jax.block_until_ready(build(True)(x_nlc, w1p, b1p, w2p, b2p))
    except Exception:
        # Fallback if this jax build rejects pipeline_mode=pl.Buffered(1).
        return jax.block_until_ready(build(False)(x_nlc, w1p, b1p, w2p, b2p))


def basic_block_pallas(x_ncl, w1, bn1, w2, bn2, eps=1e-5):
    """PyTorch-layout convenience wrapper.  x_ncl: (N, C, L) f32/bf16;
    w1/w2: (Cout, Cin, 3); bn: (gamma, beta, running_mean, running_var), (C,).
    The NCL<->NLC transpose / channel pad / slice here are network-boundary
    conversions only (stacked blocks should use basic_block_pallas_nlc)."""
    N, C, L = x_ncl.shape
    assert w1.shape == (C, C, 3) and w2.shape == (C, C, 3), \
        "identity residual path requires planes == inplanes, stride == 1"

    cp = ((C + 127) // 128) * 128            # lane-dense channel padding
    w1p, b1p, w2p, b2p = fold_bn_conv_params(w1, bn1, w2, bn2, C, cp, eps)

    x_nlc = jnp.transpose(x_ncl, (0, 2, 1))
    x_nlc = jnp.pad(x_nlc, ((0, 0), (0, 0), (0, cp - C))).astype(jnp.bfloat16)

    out = basic_block_pallas_nlc(x_nlc, w1p, b1p, w2p, b2p)

    out = out[:, :, :C].astype(x_ncl.dtype)
    return jnp.transpose(out, (0, 2, 1))     # back to PyTorch NCL


def ref_basic_block_ncl(x_ncl, w1, bn1, w2, bn2, eps=1e-5):
    """Pure-JAX reference of BasicBlock.forward (eval-mode BN), mirroring the
    kernel's numerics (bf16 conv operands, f32 accumulation/epilogue)."""
    g1, be1, m1, v1 = bn1
    g2, be2, m2, v2 = bn2
    s1 = g1 / jnp.sqrt(v1 + eps)
    s2 = g2 / jnp.sqrt(v2 + eps)
    bb1 = be1 - m1 * s1
    bb2 = be2 - m2 * s2
    w1f = (w1 * s1[:, None, None]).astype(jnp.bfloat16)
    w2f = (w2 * s2[:, None, None]).astype(jnp.bfloat16)
    xb = x_ncl.astype(jnp.bfloat16)

    def conv(h, w):
        return jax.lax.conv_general_dilated(
            h, w, window_strides=(1,), padding=((1, 1),),
            dimension_numbers=("NCH", "OIH", "NCH"),
            preferred_element_type=jnp.float32)

    h = jnp.maximum(conv(xb, w1f) + bb1[None, :, None], 0.0)
    y = conv(h.astype(jnp.bfloat16), w2f) + bb2[None, :, None] + xb.astype(jnp.float32)
    return jnp.maximum(y, 0.0)


if __name__ == "__main__":
    # Small shapes: batch=2, inplanes=planes=8, length=32 (PyTorch NCL layout).
    N, C, L = 2, 8, 32
    eps = 1e-5
    key = jax.random.PRNGKey(0)
    kx, kw1, kw2, kbn1, kbn2 = jax.random.split(key, 5)

    x = jax.random.normal(kx, (N, C, L), dtype=jnp.float32)
    w1 = jax.random.normal(kw1, (C, C, 3), dtype=jnp.float32) * 0.1
    w2 = jax.random.normal(kw2, (C, C, 3), dtype=jnp.float32) * 0.1

    def bn_params(k):
        kg, kb, km, kv = jax.random.split(k, 4)
        gamma = 1.0 + 0.1 * jax.random.normal(kg, (C,), dtype=jnp.float32)
        beta = 0.1 * jax.random.normal(kb, (C,), dtype=jnp.float32)
        mean = 0.1 * jax.random.normal(km, (C,), dtype=jnp.float32)
        var = jnp.abs(jax.random.normal(kv, (C,), dtype=jnp.float32)) + 1.0
        return gamma, beta, mean, var

    bn1 = bn_params(kbn1)
    bn2 = bn_params(kbn2)

    out = basic_block_pallas(x, w1, bn1, w2, bn2, eps=eps)
    out = jax.block_until_ready(out)

    ref = ref_basic_block_ncl(x, w1, bn1, w2, bn2, eps=eps)
    # Tolerance covers the bf16 quantization of the kernel's output store.
    np.testing.assert_allclose(np.asarray(out), np.asarray(ref),
                               rtol=1e-2, atol=1e-2)
    print("KERNEL_OK")
</pallas_src>

<mosaic_0001>
module attributes {stable_mosaic.version = 11 : i64} {
  func.func @basic_block_kernel(%arg0: i32, %arg1: memref<2x32x128xbf16, #tpu.memory_space<vmem>>, %arg2: memref<384x128xbf16, #tpu.memory_space<vmem>>, %arg3: memref<1x128xf32, #tpu.memory_space<vmem>>, %arg4: memref<384x128xbf16, #tpu.memory_space<vmem>>, %arg5: memref<1x128xf32, #tpu.memory_space<vmem>>, %arg6: memref<2x32x128xbf16, #tpu.memory_space<vmem>>) attributes {dimension_semantics = [#tpu.dimension_semantics<parallel>], iteration_bounds = array<i64: 1>, scalar_prefetch = 0 : i64, scratch_operands = 0 : i64, tpu.core_type = #tpu.core_type<tc>, window_params = [{transform_indices = @transform_0, window_bounds = array<i64: 2, 32, 128>}, {pipeline_mode = #tpu.pipeline_mode<synchronous>, transform_indices = @transform_1, window_bounds = array<i64: 384, 128>}, {pipeline_mode = #tpu.pipeline_mode<synchronous>, transform_indices = @transform_2, window_bounds = array<i64: 1, 128>}, {pipeline_mode = #tpu.pipeline_mode<synchronous>, transform_indices = @transform_3, window_bounds = array<i64: 384, 128>}, {pipeline_mode = #tpu.pipeline_mode<synchronous>, transform_indices = @transform_4, window_bounds = array<i64: 1, 128>}, {transform_indices = @transform_5, window_bounds = array<i64: 2, 32, 128>}]} {
    %c0 = arith.constant 0 : index
    %c0_0 = arith.constant 0 : index
    %c0_1 = arith.constant 0 : index
    %0 = vector.load %arg1[%c0, %c0_0, %c0_1] : memref<2x32x128xbf16, #tpu.memory_space<vmem>>, vector<2x32x128xbf16>
    %cst = arith.constant 0.000000e+00 : bf16
    %1 = vector.broadcast %cst : bf16 to vector<2x1x128xbf16>
    %2 = vector.extract_strided_slice %0 {offsets = [0, 0, 0], sizes = [2, 31, 128], strides = [1, 1, 1]} : vector<2x32x128xbf16> to vector<2x31x128xbf16>
    %3 = tpu.concatenate %1, %2 in 1 : vector<2x1x128xbf16>, vector<2x31x128xbf16> -> vector<2x32x128xbf16>
    %4 = vector.extract_strided_slice %0 {offsets = [0, 1, 0], sizes = [2, 31, 128], strides = [1, 1, 1]} : vector<2x32x128xbf16> to vector<2x31x128xbf16>
    %5 = tpu.concatenate %4, %1 in 1 : vector<2x31x128xbf16>, vector<2x1x128xbf16> -> vector<2x32x128xbf16>
    %6 = tpu.concatenate %3, %0, %5 in 2 : vector<2x32x128xbf16>, vector<2x32x128xbf16>, vector<2x32x128xbf16> -> vector<2x32x384xbf16>
    %7 = vector.shape_cast %6 : vector<2x32x384xbf16> to vector<64x384xbf16>
    %c0_2 = arith.constant 0 : index
    %c0_3 = arith.constant 0 : index
    %8 = vector.load %arg2[%c0_2, %c0_3] : memref<384x128xbf16, #tpu.memory_space<vmem>>, vector<384x128xbf16>
    %cst_4 = arith.constant dense<0.000000e+00> : vector<64x128xf32>
    %9 = tpu.matmul %7, %8, %cst_4 {dimension_numbers = #tpu.dot_dimension_numbers<[1], [0], [0], [1], [0, 0, 1, 1], [], []>} : vector<64x384xbf16>, vector<384x128xbf16>, vector<64x128xf32> -> vector<64x128xf32>
    %c0_5 = arith.constant 0 : index
    %c0_6 = arith.constant 0 : index
    %10 = vector.load %arg3[%c0_5, %c0_6] : memref<1x128xf32, #tpu.memory_space<vmem>>, vector<1x128xf32>
    %11 = vector.broadcast %10 : vector<1x128xf32> to vector<64x128xf32>
    %12 = arith.addf %9, %11 : vector<64x128xf32>
    %cst_7 = arith.constant 0.000000e+00 : f32
    %13 = vector.broadcast %cst_7 : f32 to vector<64x128xf32>
    %14 = arith.maximumf %12, %13 : vector<64x128xf32>
    %15 = arith.truncf %14 : vector<64x128xf32> to vector<64x128xbf16>
    %16 = vector.shape_cast %15 : vector<64x128xbf16> to vector<2x32x128xbf16>
    %cst_8 = arith.constant 0.000000e+00 : bf16
    %17 = vector.broadcast %cst_8 : bf16 to vector<2x1x128xbf16>
    %18 = vector.extract_strided_slice %16 {offsets = [0, 0, 0], sizes = [2, 31, 128], strides = [1, 1, 1]} : vector<2x32x128xbf16> to vector<2x31x128xbf16>
    %19 = tpu.concatenate %17, %18 in 1 : vector<2x1x128xbf16>, vector<2x31x128xbf16> -> vector<2x32x128xbf16>
    %20 = vector.extract_strided_slice %16 {offsets = [0, 1, 0], sizes = [2, 31, 128], strides = [1, 1, 1]} : vector<2x32x128xbf16> to vector<2x31x128xbf16>
    %21 = tpu.concatenate %20, %17 in 1 : vector<2x31x128xbf16>, vector<2x1x128xbf16> -> vector<2x32x128xbf16>
    %22 = tpu.concatenate %19, %16, %21 in 2 : vector<2x32x128xbf16>, vector<2x32x128xbf16>, vector<2x32x128xbf16> -> vector<2x32x384xbf16>
    %23 = vector.shape_cast %22 : vector<2x32x384xbf16> to vector<64x384xbf16>
    %c0_9 = arith.constant 0 : index
    %c0_10 = arith.constant 0 : index
    %24 = vector.load %arg4[%c0_9, %c0_10] : memref<384x128xbf16, #tpu.memory_space<vmem>>, vector<384x128xbf16>
    %cst_11 = arith.constant dense<0.000000e+00> : vector<64x128xf32>
    %25 = tpu.matmul %23, %24, %cst_11 {dimension_numbers = #tpu.dot_dimension_numbers<[1], [0], [0], [1], [0, 0, 1, 1], [], []>} : vector<64x384xbf16>, vector<384x128xbf16>, vector<64x128xf32> -> vector<64x128xf32>
    %c0_12 = arith.constant 0 : index
    %c0_13 = arith.constant 0 : index
    %26 = vector.load %arg5[%c0_12, %c0_13] : memref<1x128xf32, #tpu.memory_space<vmem>>, vector<1x128xf32>
    %27 = vector.broadcast %26 : vector<1x128xf32> to vector<64x128xf32>
    %28 = arith.addf %25, %27 : vector<64x128xf32>
    %29 = vector.shape_cast %0 : vector<2x32x128xbf16> to vector<64x128xbf16>
    %30 = arith.extf %29 : vector<64x128xbf16> to vector<64x128xf32>
    %31 = arith.addf %28, %30 : vector<64x128xf32>
    %cst_14 = arith.constant 0.000000e+00 : f32
    %32 = vector.broadcast %cst_14 : f32 to vector<64x128xf32>
    %33 = arith.maximumf %31, %32 : vector<64x128xf32>
    %34 = arith.truncf %33 : vector<64x128xf32> to vector<64x128xbf16>
    %35 = vector.shape_cast %34 : vector<64x128xbf16> to vector<2x32x128xbf16>
    %c0_15 = arith.constant 0 : index
    %c0_16 = arith.constant 0 : index
    %c0_17 = arith.constant 0 : index
    %36 = vector.load %arg6[%c0_15, %c0_16, %c0_17] : memref<2x32x128xbf16, #tpu.memory_space<vmem>>, vector<2x32x128xbf16>
    tpu.vector_store %arg6[%c0_15, %c0_16, %c0_17], %35 {strides = array<i32>} : memref<2x32x128xbf16, #tpu.memory_space<vmem>>, vector<2x32x128xbf16>,
    return
  }
  func.func @transform_0(%arg0: i32) -> (i32, i32, i32) {
    %c0_i32 = arith.constant 0 : i32
    %c0_i32_0 = arith.constant 0 : i32
    %c0_i32_1 = arith.constant 0 : i32
    return %arg0, %c0_i32, %c0_i32_0 : i32, i32, i32
  }
  func.func @transform_1(%arg0: i32) -> (i32, i32) {
    %c0_i32 = arith.constant 0 : i32
    %c0_i32_0 = arith.constant 0 : i32
    %c0_i32_1 = arith.constant 0 : i32
    return %c0_i32, %c0_i32_0 : i32, i32
  }
  func.func @transform_2(%arg0: i32) -> (i32, i32) {
    %c0_i32 = arith.constant 0 : i32
    %c0_i32_0 = arith.constant 0 : i32
    %c0_i32_1 = arith.constant 0 : i32
    return %c0_i32, %c0_i32_0 : i32, i32
  }
  func.func @transform_3(%arg0: i32) -> (i32, i32) {
    %c0_i32 = arith.constant 0 : i32
    %c0_i32_0 = arith.constant 0 : i32
    %c0_i32_1 = arith.constant 0 : i32
    return %c0_i32, %c0_i32_0 : i32, i32
  }
  func.func @transform_4(%arg0: i32) -> (i32, i32) {
    %c0_i32 = arith.constant 0 : i32
    %c0_i32_0 = arith.constant 0 : i32
    %c0_i32_1 = arith.constant 0 : i32
    return %c0_i32, %c0_i32_0 : i32, i32
  }
  func.func @transform_5(%arg0: i32) -> (i32, i32, i32) {
    %c0_i32 = arith.constant 0 : i32
    %c0_i32_0 = arith.constant 0 : i32
    %c0_i32_1 = arith.constant 0 : i32
    return %arg0, %c0_i32, %c0_i32_0 : i32, i32, i32
  }
}

module attributes {stable_mosaic.version = 11 : i64} {
  func.func @basic_block_kernel(%arg0: i32, %arg1: memref<2x32x128xbf16, #tpu.memory_space<vmem>>, %arg2: memref<384x128xbf16, #tpu.memory_space<vmem>>, %arg3: memref<1x128xf32, #tpu.memory_space<vmem>>, %arg4: memref<384x128xbf16, #tpu.memory_space<vmem>>, %arg5: memref<1x128xf32, #tpu.memory_space<vmem>>, %arg6: memref<2x32x128xbf16, #tpu.memory_space<vmem>>) attributes {dimension_semantics = [#tpu.dimension_semantics<parallel>], iteration_bounds = array<i64: 1>, scalar_prefetch = 0 : i64, scratch_operands = 0 : i64, tpu.core_type = #tpu.core_type<tc>, window_params = [{transform_indices = @transform_0, window_bounds = array<i64: 2, 32, 128>}, {pipeline_mode = #tpu.pipeline_mode<synchronous>, transform_indices = @transform_1, window_bounds = array<i64: 384, 128>}, {pipeline_mode = #tpu.pipeline_mode<synchronous>, transform_indices = @transform_2, window_bounds = array<i64: 1, 128>}, {pipeline_mode = #tpu.pipeline_mode<synchronous>, transform_indices = @transform_3, window_bounds = array<i64: 384, 128>}, {pipeline_mode = #tpu.pipeline_mode<synchronous>, transform_indices = @transform_4, window_bounds = array<i64: 1, 128>}, {transform_indices = @transform_5, window_bounds = array<i64: 2, 32, 128>}]} {
    %c0 = arith.constant 0 : index
    %c0_0 = arith.constant 0 : index
    %c0_1 = arith.constant 0 : index
    %0 = vector.load %arg1[%c0, %c0_0, %c0_1] : memref<2x32x128xbf16, #tpu.memory_space<vmem>>, vector<2x32x128xbf16>
    %cst = arith.constant 0.000000e+00 : bf16
    %1 = vector.broadcast %cst : bf16 to vector<2x1x128xbf16>
    %2 = vector.extract_strided_slice %0 {offsets = [0, 0, 0], sizes = [2, 31, 128], strides = [1, 1, 1]} : vector<2x32x128xbf16> to vector<2x31x128xbf16>
    %3 = tpu.concatenate %1, %2 in 1 : vector<2x1x128xbf16>, vector<2x31x128xbf16> -> vector<2x32x128xbf16>
    %4 = vector.extract_strided_slice %0 {offsets = [0, 1, 0], sizes = [2, 31, 128], strides = [1, 1, 1]} : vector<2x32x128xbf16> to vector<2x31x128xbf16>
    %5 = tpu.concatenate %4, %1 in 1 : vector<2x31x128xbf16>, vector<2x1x128xbf16> -> vector<2x32x128xbf16>
    %6 = tpu.concatenate %3, %0, %5 in 2 : vector<2x32x128xbf16>, vector<2x32x128xbf16>, vector<2x32x128xbf16> -> vector<2x32x384xbf16>
    %7 = vector.shape_cast %6 : vector<2x32x384xbf16> to vector<64x384xbf16>
    %c0_2 = arith.constant 0 : index
    %c0_3 = arith.constant 0 : index
    %8 = vector.load %arg2[%c0_2, %c0_3] : memref<384x128xbf16, #tpu.memory_space<vmem>>, vector<384x128xbf16>
    %cst_4 = arith.constant dense<0.000000e+00> : vector<64x128xf32>
    %9 = tpu.matmul %7, %8, %cst_4 {dimension_numbers = #tpu.dot_dimension_numbers<[1], [0], [0], [1], [0, 0, 1, 1], [], []>} : vector<64x384xbf16>, vector<384x128xbf16>, vector<64x128xf32> -> vector<64x128xf32>
    %c0_5 = arith.constant 0 : index
    %c0_6 = arith.constant 0 : index
    %10 = vector.load %arg3[%c0_5, %c0_6] : memref<1x128xf32, #tpu.memory_space<vmem>>, vector<1x128xf32>
    %11 = vector.broadcast %10 : vector<1x128xf32> to vector<64x128xf32>
    %12 = arith.addf %9, %11 : vector<64x128xf32>
    %cst_7 = arith.constant 0.000000e+00 : f32
    %13 = vector.broadcast %cst_7 : f32 to vector<64x128xf32>
    %14 = arith.maximumf %12, %13 : vector<64x128xf32>
    %15 = arith.truncf %14 : vector<64x128xf32> to vector<64x128xbf16>
    %16 = vector.shape_cast %15 : vector<64x128xbf16> to vector<2x32x128xbf16>
    %cst_8 = arith.constant 0.000000e+00 : bf16
    %17 = vector.broadcast %cst_8 : bf16 to vector<2x1x128xbf16>
    %18 = vector.extract_strided_slice %16 {offsets = [0, 0, 0], sizes = [2, 31, 128], strides = [1, 1, 1]} : vector<2x32x128xbf16> to vector<2x31x128xbf16>
    %19 = tpu.concatenate %17, %18 in 1 : vector<2x1x128xbf16>, vector<2x31x128xbf16> -> vector<2x32x128xbf16>
    %20 = vector.extract_strided_slice %16 {offsets = [0, 1, 0], sizes = [2, 31, 128], strides = [1, 1, 1]} : vector<2x32x128xbf16> to vector<2x31x128xbf16>
    %21 = tpu.concatenate %20, %17 in 1 : vector<2x31x128xbf16>, vector<2x1x128xbf16> -> vector<2x32x128xbf16>
    %22 = tpu.concatenate %19, %16, %21 in 2 : vector<2x32x128xbf16>, vector<2x32x128xbf16>, vector<2x32x128xbf16> -> vector<2x32x384xbf16>
    %23 = vector.shape_cast %22 : vector<2x32x384xbf16> to vector<64x384xbf16>
    %c0_9 = arith.constant 0 : index
    %c0_10 = arith.constant 0 : index
    %24 = vector.load %arg4[%c0_9, %c0_10] : memref<384x128xbf16, #tpu.memory_space<vmem>>, vector<384x128xbf16>
    %cst_11 = arith.constant dense<0.000000e+00> : vector<64x128xf32>
    %25 = tpu.matmul %23, %24, %cst_11 {dimension_numbers = #tpu.dot_dimension_numbers<[1], [0], [0], [1], [0, 0, 1, 1], [], []>} : vector<64x384xbf16>, vector<384x128xbf16>, vector<64x128xf32> -> vector<64x128xf32>
    %c0_12 = arith.constant 0 : index
    %c0_13 = arith.constant 0 : index
    %26 = vector.load %arg5[%c0_12, %c0_13] : memref<1x128xf32, #tpu.memory_space<vmem>>, vector<1x128xf32>
    %27 = vector.broadcast %26 : vector<1x128xf32> to vector<64x128xf32>
    %28 = arith.addf %25, %27 : vector<64x128xf32>
    %29 = vector.shape_cast %0 : vector<2x32x128xbf16> to vector<64x128xbf16>
    %30 = arith.extf %29 : vector<64x128xbf16> to vector<64x128xf32>
    %31 = arith.addf %28, %30 : vector<64x128xf32>
    %cst_14 = arith.constant 0.000000e+00 : f32
    %32 = vector.broadcast %cst_14 : f32 to vector<64x128xf32>
    %33 = arith.maximumf %31, %32 : vector<64x128xf32>
    %34 = arith.truncf %33 : vector<64x128xf32> to vector<64x128xbf16>
    %35 = vector.shape_cast %34 : vector<64x128xbf16> to vector<2x32x128xbf16>
    %c0_15 = arith.constant 0 : index
    %c0_16 = arith.constant 0 : index
    %c0_17 = arith.constant 0 : index
    %36 = vector.load %arg6[%c0_15, %c0_16, %c0_17] : memref<2x32x128xbf16, #tpu.memory_space<vmem>>, vector<2x32x128xbf16>
    tpu.vector_store %arg6[%c0_15, %c0_16, %c0_17], %35 {strides = array<i32>} : memref<2x32x128xbf16, #tpu.memory_space<vmem>>, vector<2x32x128xbf16>,
    return
  }
  func.func @transform_0(%arg0: i32) -> (i32, i32, i32) {
    %c0_i32 = arith.constant 0 : i32
    %c0_i32_0 = arith.constant 0 : i32
    %c0_i32_1 = arith.constant 0 : i32
    return %arg0, %c0_i32, %c0_i32_0 : i32, i32, i32
  }
  func.func @transform_1(%arg0: i32) -> (i32, i32) {
    %c0_i32 = arith.constant 0 : i32
    %c0_i32_0 = arith.constant 0 : i32
    %c0_i32_1 = arith.constant 0 : i32
    return %c0_i32, %c0_i32_0 : i32, i32
  }
  func.func @transform_2(%arg0: i32) -> (i32, i32) {
    %c0_i32 = arith.constant 0 : i32
    %c0_i32_0 = arith.constant 0 : i32
    %c0_i32_1 = arith.constant 0 : i32
    return %c0_i32, %c0_i32_0 : i32, i32
  }
  func.func @transform_3(%arg0: i32) -> (i32, i32) {
    %c0_i32 = arith.constant 0 : i32
    %c0_i32_0 = arith.constant 0 : i32
    %c0_i32_1 = arith.constant 0 : i32
    return %c0_i32, %c0_i32_0 : i32, i32
  }
  func.func @transform_4(%arg0: i32) -> (i32, i32) {
    %c0_i32 = arith.constant 0 : i32
    %c0_i32_0 = arith.constant 0 : i32
    %c0_i32_1 = arith.constant 0 : i32
    return %c0_i32, %c0_i32_0 : i32, i32
  }
  func.func @transform_5(%arg0: i32) -> (i32, i32, i32) {
    %c0_i32 = arith.constant 0 : i32
    %c0_i32_0 = arith.constant 0 : i32
    %c0_i32_1 = arith.constant 0 : i32
    return %arg0, %c0_i32, %c0_i32_0 : i32, i32, i32
  }
}

</mosaic_0001>

<bundles_post_ra>
// kernel: tpu_custom_call.1
= control target key start
LH: loop header
LB: loop body
LE: loop exit
PB: predicated region body
PF: predicated region fallthrough
CT: control target
= control target key end

     0   :  { %10 = vsyncpa [#allocation3], 0  ;;  %s1440_s0 = inlined_call_operand.hbm [shape: bf16[2,32,128], index: 0, kind: input, shape index: {}]   ;;  %s1441_s1 = inlined_call_operand.hbm [shape: bf16[384,128], index: 1, kind: input, shape index: {}]   ;;  %s1442_s2 = inlined_call_operand.vmem [shape: f32[1,128], index: 2, kind: input, shape index: {}]   ;;  %s1443_s3 = inlined_call_operand.hbm [shape: bf16[384,128], index: 3, kind: input, shape index: {}]   ;;  %s1444_s4 = inlined_call_operand.vmem [shape: f32[1,128], index: 4, kind: input, shape index: {}]   ;;  %s1445_s5 = inlined_call_operand.hbm [shape: bf16[2,32,128], index: 5, kind: output, shape index: {}]  }
   0x1   :  { %11 = vsyncpa [#allocation6], 0 }
   0x2   :  { %12 = vsyncpa [#allocation4], 0  ;;  %s30_s20 = sshll.u32 %s1441_s1, 4  ;;  %s1286_s21 = smov [#allocation5]   ;;  %s31_s20 = int_to_ptr.hbm [resolvable:$true] %s30_s20 }
   0x3   :  { %s32_s22 = sshll.u32 %s1286_s21, 4  ;;  %s17_s25 = sshll.u32 %s1440_s0, 4  ;;  %s33_s22 = int_to_ptr.vmem [resolvable:$true] %s32_s22  ;;  %s18_s25 = int_to_ptr.hbm [resolvable:$true] %s17_s25 }
   0x4   :  { %s1287_s26 = smov 64   ;;  %s1288_s27 = smov 4  }
   0x5   :  { %38 = dma.hbm_to_vmem [thread:$0]  %s31_s20, 3072, %s33_s22, [#allocation6], %s1287_s26, %s1287_s26, %s1288_s27  }
   0x6   :  { %s1289_s28 = smov [#allocation2]   ;;  %s45_s1 = sshll.u32 %s1443_s3, 4  ;;  %s46_s1 = int_to_ptr.hbm [resolvable:$true] %s45_s1 }
   0x7   :  { %s19_s29 = sshll.u32 %s1289_s28, 4  ;;  %s1290_s0 = smov [#allocation7]   ;;  %s20_s29 = int_to_ptr.vmem [resolvable:$true] %s19_s29 }
   0x8   :  { %25 = dma.hbm_to_vmem [thread:$0]  %s18_s25, 512, %s20_s29, [#allocation3], %s1287_s26, %s1287_s26, %s1288_s27  }
   0x9   :  { %s47_s7 = sshll.u32 %s1290_s0, 4  ;;  %s48_s7 = int_to_ptr.vmem [resolvable:$true] %s47_s7 }
   0xa   :  { %53 = dma.hbm_to_vmem [thread:$0]  %s46_s1, 3072, %s48_s7, [#allocation6], %s1287_s26, %s1287_s26, %s1288_s27  }
   0xb   :  { %1280 = dma.done.wait [#allocation3], 512  }
   0xc   :  { %1281 = vsyncadd [#allocation3], 4294966784 }
   0xd   :  { %1282 = dma.done.wait [#allocation6], 6144  }
   0xe   :  { %1283 = vsyncadd [#allocation6], 4294961152  ;;  %v1096_v0 = vld [vmem:[#allocation5 + $0x38] sm:$0xff]  ;;  %v1095_v2 = vld [vmem:[#allocation5 + $0x30] sm:$0xff]  ;;  %vm97_vm0 = vsmask.f32 256 }
   0xf   :  { %v1104_v1 = vld [vmem:[#allocation5 + $0x78] sm:$0xff]  ;;  %1160 = vmatpush.bf16.msra.mxu2 %v1096_v0  ;;  %v1103_v3 = vld [vmem:[#allocation5 + $0x70] sm:$0xff]  ;;  %355 = vmatpush.bf16.msra.mxu0 %v1096_v0  ;;  %v1094_v4 = vld [vmem:[#allocation5 + $0x28] sm:$0xff]  ;;  %vm132_vm1 = vcmask 1040384   ;;  %vm136_vm3 = vsmask.f32 7424 }
  0x10   :  { %1168 = vmatpush.bf16.msra.mxu3 %v1104_v1  ;;  %384 = vmatpush.bf16.msra.mxu1 %v1104_v1  ;;  %v1102_v5 = vld [vmem:[#allocation5 + $0x68] sm:$0xff]  ;;  %v1093_v6 = vld [vmem:[#allocation5 + $0x20] sm:$0xff]  ;;  %v1092_v8 = vld [vmem:[#allocation5 + $0x18] sm:$0xff]  ;;  %vm151_vm4 = vcmask 1047552   ;;  %s863_s13 = sshll.u32 %s1445_s5, 4  ;;  %s864_s13 = int_to_ptr.hbm [resolvable:$true] %s863_s13 }
  0x11   :  { %v1101_v7 = vld [vmem:[#allocation5 + $0x60] sm:$0xff]  ;;  %v1100_v9 = vld [vmem:[#allocation5 + $0x58] sm:$0xff]  ;;  %v1340_v10 = vld [vmem:[#allocation2 + $0x10] sm:$0xff] }
  0x12   :  { %v1091_v11 = vld [vmem:[#allocation5 + $0x10] sm:$0xff]  ;;  %v114_v13 = vshrl.u32 %v1340_v10, 16  ;;  %v1343_v14 = vld [vmem:[#allocation2] sm:$0xff]  ;;  %v1090_v16 = vld [vmem:[#allocation5 + $0x8] sm:$0xff]  ;;  %v117_v19 = vshll.u32 %v1340_v10, 16 }
  0x13   :  { %1161 = vmatpush.bf16.msra.mxu2 %v1095_v2  ;;  %356 = vmatpush.bf16.msra.mxu0 %v1095_v2  ;;  %v1099_v12 = vld [vmem:[#allocation5 + $0x50] sm:$0xff]  ;;  %v99_v15 = vshrl.u32 %v1343_v14, 16  ;;  %v1098_v17 = vld [vmem:[#allocation5 + $0x48] sm:$0xff]  ;;  %v102_v21 = vshll.u32 %v1343_v14, 16  ;;  %v1089_v22 = vld [vmem:[#allocation5] sm:$0xff] }
  0x14   :  { %1169 = vmatpush.bf16.msra.mxu3 %v1103_v3  ;;  %385 = vmatpush.bf16.msra.mxu1 %v1103_v3  ;;  %v116_v18 = vrot.slane %v114_v13, 7  ;;  %v1097_v23 = vld [vmem:[#allocation5 + $0x40] sm:$0xff]  ;;  %vm1355_vm2 = vmand %vm132_vm1, %vm97_vm0  ;;  %v1112_v26 = vld [vmem:[#allocation5 + $0xb8] sm:$0xff]  ;;  %v142_v56 = vrot.slane %v117_v19, 1 }
  0x15   :  { %v101_v20 = vrot.slane %v99_v15, 7  ;;  %v1088_v29 = vld [vmem:[#allocation2 + $0x18] sm:$0xff]  ;;  %v1111_v30 = vld [vmem:[#allocation5 + $0xb0] sm:$0xff]  ;;  %v1086_v32 = vld [vmem:[#allocation2 + $0x8] sm:$0xff]  ;;  %v137_v48 = vrot.slane %v102_v21, 1 }
  0x16   :  { %v119_v24 = vor.u32 %v117_v19, %v116_v18  ;;  %v121_v33 = vshrl.u32 %v1088_v29, 16  ;;  %v1110_v34 = vld [vmem:[#allocation5 + $0xa8] sm:$0xff]  ;;  %v106_v35 = vshrl.u32 %v1086_v32, 16  ;;  %v124_v37 = vshll.u32 %v1088_v29, 16  ;;  %v1109_v38 = vld [vmem:[#allocation5 + $0xa0] sm:$0xff]  ;;  %v1108_v42 = vld [vmem:[#allocation5 + $0x98] sm:$0xff] }
  0x17   :  { %1162 = vmatpush.bf16.msra.mxu2 %v1094_v4  ;;  %357 = vmatpush.bf16.msra.mxu0 %v1094_v4  ;;  %v104_v27 = vor.u32 %v102_v21, %v101_v20  ;;  %v109_v40 = vshll.u32 %v1086_v32, 16  ;;  %v1107_v45 = vld [vmem:[#allocation5 + $0x90] sm:$0xff]  ;;  %v1106_v47 = vld [vmem:[#allocation5 + $0x88] sm:$0xff]  ;;  %v1105_v49 = vld [vmem:[#allocation5 + $0x80] sm:$0xff]  ;;  %v138_v50 = vor.u32 %v137_v48, %v99_v15  ;;  %v143_v57 = vor.u32 %v142_v56, %v114_v13 }
  0x18   :  { %1170 = vmatpush.bf16.msra.mxu3 %v1102_v5  ;;  %386 = vmatpush.bf16.msra.mxu1 %v1102_v5  ;;  %v135_v28 = vsel %vm1355_vm2, 0, %v119_v24  ;;  %v123_v36 = vrot.slane %v121_v33, 7  ;;  %v108_v39 = vrot.slane %v106_v35, 7  ;;  %vm1371_vm5 = vmand %vm151_vm4, %vm136_vm3  ;;  %v144_v58 = vrot.slane %v124_v37, 1  ;;  %v1128_v62 = vld [vmem:[#allocation7 + $0x78] sm:$0xff]  ;;  %v1127_v63 = vld [vmem:[#allocation7 + $0x70] sm:$0xff] }
  0x19   :  { %v134_v31 = vsel %vm1355_vm2, 0, %v104_v27  ;;  %v139_v51 = vrot.slane %v109_v40, 1  ;;  %v1120_v0 = vld [vmem:[#allocation7 + $0x38] sm:$0xff]  ;;  %v1126_v1 = vld [vmem:[#allocation7 + $0x68] sm:$0xff]  ;;  %v1119_v2 = vld [vmem:[#allocation7 + $0x30] sm:$0xff] }
  0x1a   :  { %v126_v41 = vor.u32 %v124_v37, %v123_v36  ;;  %v111_v43 = vor.u32 %v109_v40, %v108_v39  ;;  %v145_v59 = vsel %vm136_vm3, %v143_v57, %v144_v58  ;;  %v146_v60 = vor.u32 %v144_v58, %v121_v33  ;;  %v1125_v3 = vld [vmem:[#allocation7 + $0x60] sm:$0xff]  ;;  %v1118_v5 = vld [vmem:[#allocation7 + $0x28] sm:$0xff]  ;;  %v1135_v13 = vld [vmem:[#allocation7 + $0xb0] sm:$0xff] }
  0x1b   :  { %1163 = vmatpush.bf16.msra.mxu2 %v1093_v6  ;;  %358 = vmatpush.bf16.msra.mxu0 %v1093_v6  ;;  %v140_v52 = vsel %vm136_vm3, %v138_v50, %v139_v51  ;;  %v141_v53 = vor.u32 %v139_v51, %v106_v35  ;;  %v1124_v6 = vld [vmem:[#allocation7 + $0x58] sm:$0xff]  ;;  %v1121_v15 = vld [vmem:[#allocation7 + $0x40] sm:$0xff] }
  0x1c   :  { %1171 = vmatpush.bf16.msra.mxu3 %v1101_v7  ;;  %387 = vmatpush.bf16.msra.mxu1 %v1101_v7  ;;  %v127_v44 = vsel %vm97_vm0, %v116_v18, %v126_v41  ;;  %v112_v46 = vsel %vm97_vm0, %v101_v20, %v111_v43  ;;  %v154_v61 = vsel %vm1371_vm5, %v146_v60, 0  ;;  %v1117_v7 = vld [vmem:[#allocation7 + $0x20] sm:$0xff]  ;;  %v1114_v18 = vld [vmem:[#allocation7 + $0x8] sm:$0xff] }
  0x1d   :  { %v153_v55 = vsel %vm1371_vm5, %v141_v53, 0  ;;  %v1133_v20 = vld [vmem:[#allocation7 + $0xa0] sm:$0xff] }
  0x1e   :  { %v1113_v21 = vld [vmem:[#allocation7] sm:$0xff] }
  0x1f   :  { %1164 = vmatpush.bf16.msra.mxu2 %v1092_v8  ;;  %359 = vmatpush.bf16.msra.mxu0 %v1092_v8  ;;  %v1123_v8 = vld [vmem:[#allocation7 + $0x50] sm:$0xff]  ;;  %v1129_v36 = vld [vmem:[#allocation7 + $0x80] sm:$0xff] }
  0x20   :  { %1172 = vmatpush.bf16.msra.mxu3 %v1100_v9  ;;  %388 = vmatpush.bf16.msra.mxu1 %v1100_v9  ;;  %v1136_v9 = vld [vmem:[#allocation7 + $0xb8] sm:$0xff] }
  0x23   :  { %1165 = vmatpush.bf16.msra.mxu2 %v1091_v11  ;;  %360 = vmatpush.bf16.msra.mxu0 %v1091_v11  ;;  %v1116_v11 = vld [vmem:[#allocation7 + $0x18] sm:$0xff] }
  0x24   :  { %1173 = vmatpush.bf16.msra.mxu3 %v1099_v12  ;;  %389 = vmatpush.bf16.msra.mxu1 %v1099_v12  ;;  %v1122_v12 = vld [vmem:[#allocation7 + $0x48] sm:$0xff] }
  0x27   :  { %1166 = vmatpush.bf16.msra.mxu2 %v1090_v16  ;;  %361 = vmatpush.bf16.msra.mxu0 %v1090_v16  ;;  %v1134_v16 = vld [vmem:[#allocation7 + $0xa8] sm:$0xff] }
  0x28   :  { %1174 = vmatpush.bf16.msra.mxu3 %v1098_v17  ;;  %390 = vmatpush.bf16.msra.mxu1 %v1098_v17 }
  0x2b   :  { %1167 = vmatpush.bf16.msra.mxu2 %v1089_v22  ;;  %362 = vmatpush.bf16.msra.mxu0 %v1089_v22 }
  0x2c   :  { %1175 = vmatpush.bf16.msra.mxu3 %v1097_v23  ;;  %391 = vmatpush.bf16.msra.mxu1 %v1097_v23  ;;  %v1132_v23 = vld [vmem:[#allocation7 + $0x98] sm:$0xff] }
  0x2e   :  { %373 = vmatmul.bf16.vlgmr.msra.gmra.mxu2 %v135_v28  ;;  %363 = vmatmul.bf16.vlgmr.msra.gmra.mxu0 %v134_v31  ;;  %v1131_v28 = vld [vmem:[#allocation7 + $0x90] sm:$0xff]  ;;  %v1130_v31 = vld [vmem:[#allocation7 + $0x88] sm:$0xff] }
  0x2f   :  { %413 = vmatpush.bf16.msrb.mxu2 %v1112_v26  ;;  %402 = vmatmul.bf16.vlgmr.msra.gmra.mxu3 %v1340_v10  ;;  %v1395_v26 = vld [vmem:[%s1442_s2] ss:$0 sm:$0xff] }
  0x30   :  { %392 = vmatmul.bf16.vlgmr.msra.gmra.mxu1 %v1343_v14  ;;  %759 = vmatpush.bf16.msrb.mxu0 %v1128_v62  ;;  %v1115_v14 = vld [vmem:[#allocation7 + $0x10] sm:$0xff] }
  0x31   :  { %730 = vmatpush.bf16.msrb.mxu3 %v1120_v0  ;;  %788 = vmatpush.bf16.msrb.mxu1 %v1136_v9 }
  0x33   :  { %414 = vmatpush.bf16.msrb.mxu2 %v1111_v30 }
  0x34   :  { %760 = vmatpush.bf16.msrb.mxu0 %v1127_v63 }
  0x35   :  { %731 = vmatpush.bf16.msrb.mxu3 %v1119_v2  ;;  %789 = vmatpush.bf16.msrb.mxu1 %v1135_v13 }
  0x37   :  { %415 = vmatpush.bf16.msrb.mxu2 %v1110_v34 }
  0x38   :  { %761 = vmatpush.bf16.msrb.mxu0 %v1126_v1 }
  0x39   :  { %732 = vmatpush.bf16.msrb.mxu3 %v1118_v5  ;;  %790 = vmatpush.bf16.msrb.mxu1 %v1134_v16 }
  0x3b   :  { %416 = vmatpush.bf16.msrb.mxu2 %v1109_v38 }
  0x3c   :  { %762 = vmatpush.bf16.msrb.mxu0 %v1125_v3 }
  0x3d   :  { %733 = vmatpush.bf16.msrb.mxu3 %v1117_v7  ;;  %791 = vmatpush.bf16.msrb.mxu1 %v1133_v20 }
  0x3e   :  { %378 = vmatmul.bf16.gmra.mxu2 %v127_v44  ;;  %368 = vmatmul.bf16.gmra.mxu0 %v112_v46 }
  0x3f   :  { %417 = vmatpush.bf16.msrb.mxu2 %v1108_v42  ;;  %407 = vmatmul.bf16.gmra.mxu3 %v1088_v29 }
  0x40   :  { %397 = vmatmul.bf16.gmra.mxu1 %v1086_v32  ;;  %763 = vmatpush.bf16.msrb.mxu0 %v1124_v6 }
  0x41   :  { %734 = vmatpush.bf16.msrb.mxu3 %v1116_v11  ;;  %792 = vmatpush.bf16.msrb.mxu1 %v1132_v23 }
  0x43   :  { %418 = vmatpush.bf16.msrb.mxu2 %v1107_v45 }
  0x44   :  { %764 = vmatpush.bf16.msrb.mxu0 %v1123_v8 }
  0x45   :  { %735 = vmatpush.bf16.msrb.mxu3 %v1115_v14  ;;  %793 = vmatpush.bf16.msrb.mxu1 %v1131_v28 }
  0x47   :  { %419 = vmatpush.bf16.msrb.mxu2 %v1106_v47 }
  0x48   :  { %765 = vmatpush.bf16.msrb.mxu0 %v1122_v12 }
  0x49   :  { %736 = vmatpush.bf16.msrb.mxu3 %v1114_v18  ;;  %794 = vmatpush.bf16.msrb.mxu1 %v1130_v31 }
  0x4b   :  { %420 = vmatpush.bf16.msrb.mxu2 %v1105_v49 }
  0x4c   :  { %766 = vmatpush.bf16.msrb.mxu0 %v1121_v15 }
  0x4d   :  { %737 = vmatpush.bf16.msrb.mxu3 %v1113_v21  ;;  %795 = vmatpush.bf16.msrb.mxu1 %v1129_v36 }
  0x4e   :  { %421 = vmatmul.bf16.vlgmr.msrb.gmra.mxu2 %v140_v52 }
  0x5e   :  { %426 = vmatmul.bf16.gmra.mxu2 %v153_v55 }
  0x6e   :  { %431 = vmatmul.bf16.gmra.mxu2 %v145_v59 }
  0x7e   :  { %436 = vmatmul.bf16.gmra.mxu2 %v154_v61 }
  0xab   :  { %v364_v19 = vpop.f32.mrf.mxu0 }
  0xac   :  { %v365_v27 = vadd.f32 %v1395_v26, %v364_v19 }
  0xad   :  { %v393_v22 = vpop.f32.mrf.mxu1 }
  0xae   :  { %v394_v30 = vadd.f32 %v393_v22, %v365_v27 }
  0xb1   :  { %v1384_v4 = vpop.f32.mrf.mxu2 }
  0xb2   :  { %v403_v60 = vpop.f32.mrf.mxu3  ;;  %v375_v6 = vadd.f32 %v1395_v26, %v1384_v4 }
  0xb3   :  { %v366_v29 = vpop.f32.mrf.mxu0 }
  0xb4   :  { %v367_v34 = vadd.f32 %v1395_v26, %v366_v29  ;;  %v404_v13 = vadd.f32 %v403_v60, %v375_v6 }
  0xb5   :  { %v395_v32 = vpop.f32.mrf.mxu1 }
  0xb6   :  { %v396_v38 = vadd.f32 %v395_v32, %v367_v34 }
  0xb9   :  { %v1386_v10 = vpop.f32.mrf.mxu2 }
  0xba   :  { %v405_v11 = vpop.f32.mrf.mxu3  ;;  %v377_v16 = vadd.f32 %v1395_v26, %v1386_v10 }
  0xbb   :  { %v369_v37 = vpop.f32.mrf.mxu0 }
  0xbc   :  { %v370_v44 = vadd.f32 %v1395_v26, %v369_v37  ;;  %v406_v27 = vadd.f32 %v405_v11, %v377_v16  ;;  %v1424_v11 = vld [vmem:[%s1444_s4] ss:$0 sm:$0xff]  ;;  %s1291_s4 = smov [#allocation8]  }
  0xbd   :  { %v398_v42 = vpop.f32.mrf.mxu1  ;;  %s861_s10 = sshll.u32 %s1291_s4, 4  ;;  %s862_s10 = int_to_ptr.vmem [resolvable:$true] %s861_s10 }
  0xbe   :  { %v399_v48 = vadd.f32 %v398_v42, %v370_v44 }
  0xc1   :  { %v1388_v17 = vpop.f32.mrf.mxu2 }
  0xc3   :  { %v371_v50 = vpop.f32.mrf.mxu0 }
  0xc4   :  { %v372_v53 = vadd.f32 %v1395_v26, %v371_v50 }
  0xc5   :  { %v400_v57 = vpop.f32.mrf.mxu1 }
  0xc6   :  { %v401_v61 = vadd.f32 %v400_v57, %v372_v53 }
  0xc9   :  { %v1390_v24 = vpop.f32.mrf.mxu2 }
  0xca   :  { %v382_v42 = vadd.f32 %v1395_v26, %v1390_v24 }
  0xd1   :  { %v422_v33 = vpop.f32.mrf.mxu2 }
  0xd2   :  { %v423_v35 = vadd.f32 %v422_v33, %v394_v30  ;;  %v408_v33 = vpop.f32.mrf.mxu3 }
  0xd4   :  { %v442_v39 = vmax.f32 %v423_v35, 0.0  ;;  %v380_v35 = vadd.f32 %v1395_v26, %v1388_v17 }
  0xd6   :  { %v450_v43 = vpack.c.bf16 %v442_v39, %v442_v39 }
  0xd8   :  { %v466_v47 = vunpack.c.l.b16 %v450_v43 }
  0xd9   :  { %v424_v40 = vpop.f32.mrf.mxu2 }
  0xda   :  { %v425_v41 = vadd.f32 %v424_v40, %v396_v38  ;;  %v409_v40 = vadd.f32 %v408_v33, %v380_v35 }
  0xdc   :  { %v443_v45 = vmax.f32 %v425_v41, 0.0 }
  0xde   :  { %v451_v46 = vpack.c.bf16 %v443_v45, %v443_v45 }
  0xe0   :  { %v467_v49 = vunpack.c.l.b16 %v451_v46  ;;  %v410_v46 = vpop.f32.mrf.mxu3 }
  0xe1   :  { %v427_v51 = vpop.f32.mrf.mxu2 }
  0xe2   :  { %v474_v52 = vpack.c.b16 %v467_v49, %v466_v47  ;;  %v428_v55 = vadd.f32 %v427_v51, %v399_v48  ;;  %v411_v49 = vadd.f32 %v410_v46, %v382_v42 }
  0xe4   :  { %767 = vmatmul.bf16.vlgmr.msrb.gmra.mxu0 %v474_v52  ;;  %v479_v56 = vshrl.u32 %v474_v52, 16  ;;  %v482_v59 = vshll.u32 %v474_v52, 16  ;;  %v444_v62 = vmax.f32 %v428_v55, 0.0 }
  0xe6   :  { %v481_v58 = vrot.slane %v479_v56, 7  ;;  %v452_v3 = vpack.c.bf16 %v444_v62, %v444_v62  ;;  %v514_v14 = vrot.slane %v482_v59, 1 }
  0xe8   :  { %v484_v63 = vor.u32 %v482_v59, %v481_v58  ;;  %v468_v8 = vunpack.c.l.b16 %v452_v3  ;;  %v515_v21 = vor.u32 %v514_v14, %v479_v56 }
  0xe9   :  { %v429_v0 = vpop.f32.mrf.mxu2 }
  0xea   :  { %v430_v1 = vadd.f32 %v429_v0, %v401_v61  ;;  %v512_v2 = vsel %vm1355_vm2, 0, %v484_v63 }
  0xeb   :  { %738 = vmatmul.bf16.vlgmr.msrb.gmra.mxu3 %v512_v2 }
  0xec   :  { %v445_v5 = vmax.f32 %v430_v1, 0.0 }
  0xee   :  { %v453_v7 = vpack.c.bf16 %v445_v5, %v445_v5 }
  0xf0   :  { %v469_v9 = vunpack.c.l.b16 %v453_v7 }
  0xf1   :  { %v432_v12 = vpop.f32.mrf.mxu2 }
  0xf2   :  { %v475_v15 = vpack.c.b16 %v469_v9, %v468_v8  ;;  %v433_v18 = vadd.f32 %v432_v12, %v404_v13 }
  0xf4   :  { %v486_v19 = vshrl.u32 %v475_v15, 16  ;;  %772 = vmatmul.bf16.gmra.mxu0 %v475_v15  ;;  %v489_v20 = vshll.u32 %v475_v15, 16  ;;  %v446_v4 = vmax.f32 %v433_v18, 0.0  ;;  %v69_v15 = vld [vmem:[#allocation2] sm:$0xff]  }
  0xf6   :  { %v516_v22 = vrot.slane %v489_v20, 1  ;;  %v488_v23 = vrot.slane %v486_v19, 7  ;;  %v454_v10 = vpack.c.bf16 %v446_v4, %v446_v4 }
  0xf8   :  { %v517_v28 = vsel %vm136_vm3, %v515_v21, %v516_v22  ;;  %v491_v29 = vor.u32 %v489_v20, %v488_v23  ;;  %v470_v37 = vunpack.c.l.b16 %v454_v10  ;;  %v518_v44 = vor.u32 %v516_v22, %v486_v19 }
  0xf9   :  { %v434_v30 = vpop.f32.mrf.mxu2  ;;  %796 = vmatmul.bf16.vlgmr.msrb.gmra.mxu1 %v517_v28  ;;  %v817_v20 = vunpack.c.l.bf16 %v69_v15  ;;  %v818_v22 = vunpack.c.h.bf16 %v69_v15 }
  0xfa   :  { %v435_v31 = vadd.f32 %v434_v30, %v406_v27  ;;  %v492_v32 = vsel %vm97_vm0, %v481_v58, %v491_v29  ;;  %v528_v17 = vsel %vm1371_vm5, %v518_v44, 0 }
  0xfb   :  { %743 = vmatmul.bf16.gmra.mxu3 %v492_v32 }
  0xfc   :  { %v447_v34 = vmax.f32 %v435_v31, 0.0 }
  0xfe   :  { %v455_v36 = vpack.c.bf16 %v447_v34, %v447_v34 }
 0x100   :  { %v471_v38 = vunpack.c.l.b16 %v455_v36  ;;  %v71_v36 = vld [vmem:[#allocation2 + $0x8] sm:$0xff]  }
 0x101   :  { %v437_v39 = vpop.f32.mrf.mxu2 }
 0x102   :  { %v476_v41 = vpack.c.b16 %v471_v38, %v470_v37  ;;  %v438_v43 = vadd.f32 %v437_v39, %v409_v40  ;;  %v819_v40 = vunpack.c.l.bf16 %v71_v36 }
 0x104   :  { %777 = vmatmul.bf16.gmra.mxu0 %v476_v41  ;;  %v494_v45 = vshrl.u32 %v476_v41, 16  ;;  %v497_v48 = vshll.u32 %v476_v41, 16  ;;  %v448_v50 = vmax.f32 %v438_v43, 0.0  ;;  %v820_v43 = vunpack.c.h.bf16 %v71_v36 }
 0x106   :  { %v496_v47 = vrot.slane %v494_v45, 7  ;;  %v456_v24 = vpack.c.bf16 %v448_v50, %v448_v50  ;;  %v519_v59 = vrot.slane %v497_v48, 1 }
 0x108   :  { %v499_v51 = vor.u32 %v497_v48, %v496_v47  ;;  %v472_v57 = vunpack.c.l.b16 %v456_v24  ;;  %v520_v63 = vor.u32 %v519_v59, %v494_v45  ;;  %v73_v24 = vld [vmem:[#allocation2 + $0x10] sm:$0xff]  }
 0x109   :  { %v439_v52 = vpop.f32.mrf.mxu2  ;;  %801 = vmatmul.bf16.gmra.mxu1 %v528_v17 }
 0x10a   :  { %v440_v53 = vadd.f32 %v439_v52, %v411_v49  ;;  %v513_v55 = vsel %vm1355_vm2, 0, %v499_v51 }
 0x10b   :  { %748 = vmatmul.bf16.gmra.mxu3 %v513_v55 }
 0x10c   :  { %v449_v26 = vmax.f32 %v440_v53, 0.0 }
 0x10e   :  { %v457_v56 = vpack.c.bf16 %v449_v26, %v449_v26 }
 0x110   :  { %v473_v58 = vunpack.c.l.b16 %v457_v56 }
 0x112   :  { %v477_v60 = vpack.c.b16 %v473_v58, %v472_v57  ;;  %v821_v58 = vunpack.c.l.bf16 %v73_v24 }
 0x114   :  { %v501_v61 = vshrl.u32 %v477_v60, 16  ;;  %782 = vmatmul.bf16.gmra.mxu0 %v477_v60  ;;  %v504_v62 = vshll.u32 %v477_v60, 16  ;;  %v822_v60 = vunpack.c.h.bf16 %v73_v24 }
 0x116   :  { %v521_v0 = vrot.slane %v504_v62, 1  ;;  %v503_v1 = vrot.slane %v501_v61, 7 }
 0x118   :  { %v522_v2 = vsel %vm136_vm3, %v520_v63, %v521_v0  ;;  %v506_v3 = vor.u32 %v504_v62, %v503_v1  ;;  %v523_v5 = vor.u32 %v521_v0, %v501_v61 }
 0x119   :  { %806 = vmatmul.bf16.gmra.mxu1 %v522_v2 }
 0x11a   :  { %v507_v25 = vsel %vm97_vm0, %v496_v47, %v506_v3  ;;  %v529_v6 = vsel %vm1371_vm5, %v523_v5, 0 }
 0x11b   :  { %753 = vmatmul.bf16.gmra.mxu3 %v507_v25 }
 0x129   :  { %811 = vmatmul.bf16.gmra.mxu1 %v529_v6 }
 0x161   :  { %v768_v7 = vpop.f32.mrf.mxu0 }
 0x169   :  { %v770_v9 = vpop.f32.mrf.mxu0 }
 0x16e   :  { %v739_v8 = vpop.f32.mrf.mxu3 }
 0x16f   :  { %v740_v12 = vadd.f32 %v1424_v11, %v739_v8 }
 0x171   :  { %v773_v16 = vpop.f32.mrf.mxu0  ;;  %v769_v19 = vadd.f32 %v768_v7, %v740_v12 }
 0x176   :  { %v741_v13 = vpop.f32.mrf.mxu3  ;;  %v797_v14 = vpop.f32.mrf.mxu1 }
 0x177   :  { %v742_v18 = vadd.f32 %v1424_v11, %v741_v13  ;;  %v798_v54 = vadd.f32 %v797_v14, %v769_v19 }
 0x179   :  { %v771_v21 = vadd.f32 %v770_v9, %v742_v18  ;;  %v825_v4 = vadd.f32 %v817_v20, %v798_v54  ;;  %v775_v31 = vpop.f32.mrf.mxu0  ;;  %v75_v9 = vld [vmem:[#allocation2 + $0x18] sm:$0xff]  }
 0x17a   :  { %v823_v15 = vunpack.c.l.bf16 %v75_v9  ;;  %v824_v19 = vunpack.c.h.bf16 %v75_v9 }
 0x17b   :  { %v833_v30 = vmax.f32 %v825_v4, 0.0 }
 0x17e   :  { %v744_v23 = vpop.f32.mrf.mxu3  ;;  %v799_v27 = vpop.f32.mrf.mxu1 }
 0x17f   :  { %v800_v28 = vadd.f32 %v799_v27, %v771_v21  ;;  %v745_v33 = vadd.f32 %v1424_v11, %v744_v23 }
 0x181   :  { %v826_v29 = vadd.f32 %v818_v22, %v800_v28  ;;  %v774_v38 = vadd.f32 %v773_v16, %v745_v33  ;;  %v778_v41 = vpop.f32.mrf.mxu0 }
 0x183   :  { %v834_v32 = vmax.f32 %v826_v29, 0.0 }
 0x185   :  { %v1140_v10 = vpack.c.bf16 %v834_v32, %v833_v30 }
 0x186   :  { %v746_v34 = vpop.f32.mrf.mxu3  ;;  %v802_v35 = vpop.f32.mrf.mxu1 }
 0x187   :  { %1141 = vst [vmem:[#allocation8] sm:$0xff] %v1140_v10   ;;  %v747_v37 = vadd.f32 %v1424_v11, %v746_v34  ;;  %v803_v39 = vadd.f32 %v802_v35, %v774_v38 }
 0x189   :  { %v776_v42 = vadd.f32 %v775_v31, %v747_v37  ;;  %v827_v46 = vadd.f32 %v819_v40, %v803_v39  ;;  %v780_v55 = vpop.f32.mrf.mxu0 }
 0x18b   :  { %v835_v49 = vmax.f32 %v827_v46, 0.0 }
 0x18e   :  { %v749_v44 = vpop.f32.mrf.mxu3  ;;  %v804_v45 = vpop.f32.mrf.mxu1 }
 0x18f   :  { %v805_v47 = vadd.f32 %v804_v45, %v776_v42  ;;  %v750_v17 = vadd.f32 %v1424_v11, %v749_v44 }
 0x191   :  { %v828_v48 = vadd.f32 %v820_v43, %v805_v47  ;;  %v779_v56 = vadd.f32 %v778_v41, %v750_v17  ;;  %v783_v2 = vpop.f32.mrf.mxu0 }
 0x193   :  { %v836_v50 = vmax.f32 %v828_v48, 0.0 }
 0x195   :  { %v1145_v51 = vpack.c.bf16 %v836_v50, %v835_v49 }
 0x196   :  { %v751_v52 = vpop.f32.mrf.mxu3  ;;  %v807_v53 = vpop.f32.mrf.mxu1 }
 0x197   :  { %1157 = vst [vmem:[#allocation8 + $0x8] sm:$0xff] %v1145_v51   ;;  %v752_v26 = vadd.f32 %v1424_v11, %v751_v52  ;;  %v808_v57 = vadd.f32 %v807_v53, %v779_v56 }
 0x199   :  { %v781_v59 = vadd.f32 %v780_v55, %v752_v26  ;;  %v829_v63 = vadd.f32 %v821_v58, %v808_v57  ;;  %v785_v16 = vpop.f32.mrf.mxu0 }
 0x19b   :  { %v837_v3 = vmax.f32 %v829_v63, 0.0 }
 0x19e   :  { %v754_v61 = vpop.f32.mrf.mxu3  ;;  %v809_v62 = vpop.f32.mrf.mxu1 }
 0x19f   :  { %v810_v0 = vadd.f32 %v809_v62, %v781_v59  ;;  %v755_v5 = vadd.f32 %v1424_v11, %v754_v61 }
 0x1a1   :  { %v830_v1 = vadd.f32 %v822_v60, %v810_v0  ;;  %v784_v13 = vadd.f32 %v783_v2, %v755_v5 }
 0x1a3   :  { %v838_v25 = vmax.f32 %v830_v1, 0.0 }
 0x1a5   :  { %v1150_v6 = vpack.c.bf16 %v838_v25, %v837_v3 }
 0x1a6   :  { %v756_v7 = vpop.f32.mrf.mxu3  ;;  %v812_v8 = vpop.f32.mrf.mxu1 }
 0x1a7   :  { %1158 = vst [vmem:[#allocation8 + $0x10] sm:$0xff] %v1150_v6   ;;  %v757_v12 = vadd.f32 %v1424_v11, %v756_v7  ;;  %v813_v14 = vadd.f32 %v812_v8, %v784_v13 }
 0x1a9   :  { %v786_v18 = vadd.f32 %v785_v16, %v757_v12  ;;  %v831_v20 = vadd.f32 %v823_v15, %v813_v14 }
 0x1ab   :  { %v839_v23 = vmax.f32 %v831_v20, 0.0 }
 0x1ae   :  { %v814_v54 = vpop.f32.mrf.mxu1 }
 0x1af   :  { %v815_v21 = vadd.f32 %v814_v54, %v786_v18 }
 0x1b1   :  { %v832_v22 = vadd.f32 %v824_v19, %v815_v21 }
 0x1b3   :  { %v840_v27 = vmax.f32 %v832_v22, 0.0 }
 0x1b5   :  { %v1155_v4 = vpack.c.bf16 %v840_v27, %v839_v23 }
 0x1b7   :  { %1159 = vst [vmem:[#allocation8 + $0x18] sm:$0xff] %v1155_v4  }
 0x1b8   :  { %869 = dma.vmem_to_hbm [thread:$0]  %s862_s10, 512, %s864_s13, [#allocation4], %s1287_s26, %s1287_s26, %s1288_s27  }
 0x1b9   :  { %1284 = dma.done.wait [#allocation4], 512  }
 0x1ba   :  { %1285 = vsyncadd [#allocation4], 4294966784 }
 0x1bb   :  { %874 = vsyncpa [#allocation3], 1 }
 0x1bc   :  { %875 = vsyncpa [#allocation6], 1 }
 0x1bd   :  { %876 = vsyncpa [#allocation4], 1 }

// kernel: tpu_custom_call.1
= control target key start
LH: loop header
LB: loop body
LE: loop exit
PB: predicated region body
PF: predicated region fallthrough
CT: control target
= control target key end

     0   :  { %10 = vsyncpa [#allocation3], 0  ;;  %s1440_s0 = inlined_call_operand.hbm [shape: bf16[2,32,128], index: 0, kind: input, shape index: {}]   ;;  %s1441_s1 = inlined_call_operand.hbm [shape: bf16[384,128], index: 1, kind: input, shape index: {}]   ;;  %s1442_s2 = inlined_call_operand.vmem [shape: f32[1,128], index: 2, kind: input, shape index: {}]   ;;  %s1443_s3 = inlined_call_operand.hbm [shape: bf16[384,128], index: 3, kind: input, shape index: {}]   ;;  %s1444_s4 = inlined_call_operand.vmem [shape: f32[1,128], index: 4, kind: input, shape index: {}]   ;;  %s1445_s5 = inlined_call_operand.hbm [shape: bf16[2,32,128], index: 5, kind: output, shape index: {}]  }
   0x1   :  { %11 = vsyncpa [#allocation6], 0 }
   0x2   :  { %12 = vsyncpa [#allocation4], 0  ;;  %s30_s20 = sshll.u32 %s1441_s1, 4  ;;  %s1286_s21 = smov [#allocation5]   ;;  %s31_s20 = int_to_ptr.hbm [resolvable:$true] %s30_s20 }
   0x3   :  { %s32_s22 = sshll.u32 %s1286_s21, 4  ;;  %s17_s25 = sshll.u32 %s1440_s0, 4  ;;  %s33_s22 = int_to_ptr.vmem [resolvable:$true] %s32_s22  ;;  %s18_s25 = int_to_ptr.hbm [resolvable:$true] %s17_s25 }
   0x4   :  { %s1287_s26 = smov 64   ;;  %s1288_s27 = smov 4  }
   0x5   :  { %38 = dma.hbm_to_vmem [thread:$0]  %s31_s20, 3072, %s33_s22, [#allocation6], %s1287_s26, %s1287_s26, %s1288_s27  }
   0x6   :  { %s1289_s28 = smov [#allocation2]   ;;  %s45_s1 = sshll.u32 %s1443_s3, 4  ;;  %s46_s1 = int_to_ptr.hbm [resolvable:$true] %s45_s1 }
   0x7   :  { %s19_s29 = sshll.u32 %s1289_s28, 4  ;;  %s1290_s0 = smov [#allocation7]   ;;  %s20_s29 = int_to_ptr.vmem [resolvable:$true] %s19_s29 }
   0x8   :  { %25 = dma.hbm_to_vmem [thread:$0]  %s18_s25, 512, %s20_s29, [#allocation3], %s1287_s26, %s1287_s26, %s1288_s27  }
   0x9   :  { %s47_s7 = sshll.u32 %s1290_s0, 4  ;;  %s48_s7 = int_to_ptr.vmem [resolvable:$true] %s47_s7 }
   0xa   :  { %53 = dma.hbm_to_vmem [thread:$0]  %s46_s1, 3072, %s48_s7, [#allocation6], %s1287_s26, %s1287_s26, %s1288_s27  }
   0xb   :  { %1280 = dma.done.wait [#allocation3], 512  }
   0xc   :  { %1281 = vsyncadd [#allocation3], 4294966784 }
   0xd   :  { %1282 = dma.done.wait [#allocation6], 6144  }
   0xe   :  { %1283 = vsyncadd [#allocation6], 4294961152  ;;  %v1096_v0 = vld [vmem:[#allocation5 + $0x38] sm:$0xff]  ;;  %v1095_v2 = vld [vmem:[#allocation5 + $0x30] sm:$0xff]  ;;  %vm97_vm0 = vsmask.f32 256 }
   0xf   :  { %v1104_v1 = vld [vmem:[#allocation5 + $0x78] sm:$0xff]  ;;  %1160 = vmatpush.bf16.msra.mxu2 %v1096_v0  ;;  %v1103_v3 = vld [vmem:[#allocation5 + $0x70] sm:$0xff]  ;;  %355 = vmatpush.bf16.msra.mxu0 %v1096_v0  ;;  %v1094_v4 = vld [vmem:[#allocation5 + $0x28] sm:$0xff]  ;;  %vm132_vm1 = vcmask 1040384   ;;  %vm136_vm3 = vsmask.f32 7424 }
  0x10   :  { %1168 = vmatpush.bf16.msra.mxu3 %v1104_v1  ;;  %384 = vmatpush.bf16.msra.mxu1 %v1104_v1  ;;  %v1102_v5 = vld [vmem:[#allocation5 + $0x68] sm:$0xff]  ;;  %v1093_v6 = vld [vmem:[#allocation5 + $0x20] sm:$0xff]  ;;  %v1092_v8 = vld [vmem:[#allocation5 + $0x18] sm:$0xff]  ;;  %vm151_vm4 = vcmask 1047552   ;;  %s863_s13 = sshll.u32 %s1445_s5, 4  ;;  %s864_s13 = int_to_ptr.hbm [resolvable:$true] %s863_s13 }
  0x11   :  { %v1101_v7 = vld [vmem:[#allocation5 + $0x60] sm:$0xff]  ;;  %v1100_v9 = vld [vmem:[#allocation5 + $0x58] sm:$0xff]  ;;  %v1340_v10 = vld [vmem:[#allocation2 + $0x10] sm:$0xff] }
  0x12   :  { %v1091_v11 = vld [vmem:[#allocation5 + $0x10] sm:$0xff]  ;;  %v114_v13 = vshrl.u32 %v1340_v10, 16  ;;  %v1343_v14 = vld [vmem:[#allocation2] sm:$0xff]  ;;  %v1090_v16 = vld [vmem:[#allocation5 + $0x8] sm:$0xff]  ;;  %v117_v19 = vshll.u32 %v1340_v10, 16 }
  0x13   :  { %1161 = vmatpush.bf16.msra.mxu2 %v1095_v2  ;;  %356 = vmatpush.bf16.msra.mxu0 %v1095_v2  ;;  %v1099_v12 = vld [vmem:[#allocation5 + $0x50] sm:$0xff]  ;;  %v99_v15 = vshrl.u32 %v1343_v14, 16  ;;  %v1098_v17 = vld [vmem:[#allocation5 + $0x48] sm:$0xff]  ;;  %v102_v21 = vshll.u32 %v1343_v14, 16  ;;  %v1089_v22 = vld [vmem:[#allocation5] sm:$0xff] }
  0x14   :  { %1169 = vmatpush.bf16.msra.mxu3 %v1103_v3  ;;  %385 = vmatpush.bf16.msra.mxu1 %v1103_v3  ;;  %v116_v18 = vrot.slane %v114_v13, 7  ;;  %v1097_v23 = vld [vmem:[#allocation5 + $0x40] sm:$0xff]  ;;  %vm1355_vm2 = vmand %vm132_vm1, %vm97_vm0  ;;  %v1112_v26 = vld [vmem:[#allocation5 + $0xb8] sm:$0xff]  ;;  %v142_v56 = vrot.slane %v117_v19, 1 }
  0x15   :  { %v101_v20 = vrot.slane %v99_v15, 7  ;;  %v1088_v29 = vld [vmem:[#allocation2 + $0x18] sm:$0xff]  ;;  %v1111_v30 = vld [vmem:[#allocation5 + $0xb0] sm:$0xff]  ;;  %v1086_v32 = vld [vmem:[#allocation2 + $0x8] sm:$0xff]  ;;  %v137_v48 = vrot.slane %v102_v21, 1 }
  0x16   :  { %v119_v24 = vor.u32 %v117_v19, %v116_v18  ;;  %v121_v33 = vshrl.u32 %v1088_v29, 16  ;;  %v1110_v34 = vld [vmem:[#allocation5 + $0xa8] sm:$0xff]  ;;  %v106_v35 = vshrl.u32 %v1086_v32, 16  ;;  %v124_v37 = vshll.u32 %v1088_v29, 16  ;;  %v1109_v38 = vld [vmem:[#allocation5 + $0xa0] sm:$0xff]  ;;  %v1108_v42 = vld [vmem:[#allocation5 + $0x98] sm:$0xff] }
  0x17   :  { %1162 = vmatpush.bf16.msra.mxu2 %v1094_v4  ;;  %357 = vmatpush.bf16.msra.mxu0 %v1094_v4  ;;  %v104_v27 = vor.u32 %v102_v21, %v101_v20  ;;  %v109_v40 = vshll.u32 %v1086_v32, 16  ;;  %v1107_v45 = vld [vmem:[#allocation5 + $0x90] sm:$0xff]  ;;  %v1106_v47 = vld [vmem:[#allocation5 + $0x88] sm:$0xff]  ;;  %v1105_v49 = vld [vmem:[#allocation5 + $0x80] sm:$0xff]  ;;  %v138_v50 = vor.u32 %v137_v48, %v99_v15  ;;  %v143_v57 = vor.u32 %v142_v56, %v114_v13 }
  0x18   :  { %1170 = vmatpush.bf16.msra.mxu3 %v1102_v5  ;;  %386 = vmatpush.bf16.msra.mxu1 %v1102_v5  ;;  %v135_v28 = vsel %vm1355_vm2, 0, %v119_v24  ;;  %v123_v36 = vrot.slane %v121_v33, 7  ;;  %v108_v39 = vrot.slane %v106_v35, 7  ;;  %vm1371_vm5 = vmand %vm151_vm4, %vm136_vm3  ;;  %v144_v58 = vrot.slane %v124_v37, 1  ;;  %v1128_v62 = vld [vmem:[#allocation7 + $0x78] sm:$0xff]  ;;  %v1127_v63 = vld [vmem:[#allocation7 + $0x70] sm:$0xff] }
  0x19   :  { %v134_v31 = vsel %vm1355_vm2, 0, %v104_v27  ;;  %v139_v51 = vrot.slane %v109_v40, 1  ;;  %v1120_v0 = vld [vmem:[#allocation7 + $0x38] sm:$0xff]  ;;  %v1126_v1 = vld [vmem:[#allocation7 + $0x68] sm:$0xff]  ;;  %v1119_v2 = vld [vmem:[#allocation7 + $0x30] sm:$0xff] }
  0x1a   :  { %v126_v41 = vor.u32 %v124_v37, %v123_v36  ;;  %v111_v43 = vor.u32 %v109_v40, %v108_v39  ;;  %v145_v59 = vsel %vm136_vm3, %v143_v57, %v144_v58  ;;  %v146_v60 = vor.u32 %v144_v58, %v121_v33  ;;  %v1125_v3 = vld [vmem:[#allocation7 + $0x60] sm:$0xff]  ;;  %v1118_v5 = vld [vmem:[#allocation7 + $0x28] sm:$0xff]  ;;  %v1135_v13 = vld [vmem:[#allocation7 + $0xb0] sm:$0xff] }
  0x1b   :  { %1163 = vmatpush.bf16.msra.mxu2 %v1093_v6  ;;  %358 = vmatpush.bf16.msra.mxu0 %v1093_v6  ;;  %v140_v52 = vsel %vm136_vm3, %v138_v50, %v139_v51  ;;  %v141_v53 = vor.u32 %v139_v51, %v106_v35  ;;  %v1124_v6 = vld [vmem:[#allocation7 + $0x58] sm:$0xff]  ;;  %v1121_v15 = vld [vmem:[#allocation7 + $0x40] sm:$0xff] }
  0x1c   :  { %1171 = vmatpush.bf16.msra.mxu3 %v1101_v7  ;;  %387 = vmatpush.bf16.msra.mxu1 %v1101_v7  ;;  %v127_v44 = vsel %vm97_vm0, %v116_v18, %v126_v41  ;;  %v112_v46 = vsel %vm97_vm0, %v101_v20, %v111_v43  ;;  %v154_v61 = vsel %vm1371_vm5, %v146_v60, 0  ;;  %v1117_v7 = vld [vmem:[#allocation7 + $0x20] sm:$0xff]  ;;  %v1114_v18 = vld [vmem:[#allocation7 + $0x8] sm:$0xff] }
  0x1d   :  { %v153_v55 = vsel %vm1371_vm5, %v141_v53, 0  ;;  %v1133_v20 = vld [vmem:[#allocation7 + $0xa0] sm:$0xff] }
  0x1e   :  { %v1113_v21 = vld [vmem:[#allocation7] sm:$0xff] }
  0x1f   :  { %1164 = vmatpush.bf16.msra.mxu2 %v1092_v8  ;;  %359 = vmatpush.bf16.msra.mxu0 %v1092_v8  ;;  %v1123_v8 = vld [vmem:[#allocation7 + $0x50] sm:$0xff]  ;;  %v1129_v36 = vld [vmem:[#allocation7 + $0x80] sm:$0xff] }
  0x20   :  { %1172 = vmatpush.bf16.msra.mxu3 %v1100_v9  ;;  %388 = vmatpush.bf16.msra.mxu1 %v1100_v9  ;;  %v1136_v9 = vld [vmem:[#allocation7 + $0xb8] sm:$0xff] }
  0x23   :  { %1165 = vmatpush.bf16.msra.mxu2 %v1091_v11  ;;  %360 = vmatpush.bf16.msra.mxu0 %v1091_v11  ;;  %v1116_v11 = vld [vmem:[#allocation7 + $0x18] sm:$0xff] }
  0x24   :  { %1173 = vmatpush.bf16.msra.mxu3 %v1099_v12  ;;  %389 = vmatpush.bf16.msra.mxu1 %v1099_v12  ;;  %v1122_v12 = vld [vmem:[#allocation7 + $0x48] sm:$0xff] }
  0x27   :  { %1166 = vmatpush.bf16.msra.mxu2 %v1090_v16  ;;  %361 = vmatpush.bf16.msra.mxu0 %v1090_v16  ;;  %v1134_v16 = vld [vmem:[#allocation7 + $0xa8] sm:$0xff] }
  0x28   :  { %1174 = vmatpush.bf16.msra.mxu3 %v1098_v17  ;;  %390 = vmatpush.bf16.msra.mxu1 %v1098_v17 }
  0x2b   :  { %1167 = vmatpush.bf16.msra.mxu2 %v1089_v22  ;;  %362 = vmatpush.bf16.msra.mxu0 %v1089_v22 }
  0x2c   :  { %1175 = vmatpush.bf16.msra.mxu3 %v1097_v23  ;;  %391 = vmatpush.bf16.msra.mxu1 %v1097_v23  ;;  %v1132_v23 = vld [vmem:[#allocation7 + $0x98] sm:$0xff] }
  0x2e   :  { %373 = vmatmul.bf16.vlgmr.msra.gmra.mxu2 %v135_v28  ;;  %363 = vmatmul.bf16.vlgmr.msra.gmra.mxu0 %v134_v31  ;;  %v1131_v28 = vld [vmem:[#allocation7 + $0x90] sm:$0xff]  ;;  %v1130_v31 = vld [vmem:[#allocation7 + $0x88] sm:$0xff] }
  0x2f   :  { %413 = vmatpush.bf16.msrb.mxu2 %v1112_v26  ;;  %402 = vmatmul.bf16.vlgmr.msra.gmra.mxu3 %v1340_v10  ;;  %v1395_v26 = vld [vmem:[%s1442_s2] ss:$0 sm:$0xff] }
  0x30   :  { %392 = vmatmul.bf16.vlgmr.msra.gmra.mxu1 %v1343_v14  ;;  %759 = vmatpush.bf16.msrb.mxu0 %v1128_v62  ;;  %v1115_v14 = vld [vmem:[#allocation7 + $0x10] sm:$0xff] }
  0x31   :  { %730 = vmatpush.bf16.msrb.mxu3 %v1120_v0  ;;  %788 = vmatpush.bf16.msrb.mxu1 %v1136_v9 }
  0x33   :  { %414 = vmatpush.bf16.msrb.mxu2 %v1111_v30 }
  0x34   :  { %760 = vmatpush.bf16.msrb.mxu0 %v1127_v63 }
  0x35   :  { %731 = vmatpush.bf16.msrb.mxu3 %v1119_v2  ;;  %789 = vmatpush.bf16.msrb.mxu1 %v1135_v13 }
  0x37   :  { %415 = vmatpush.bf16.msrb.mxu2 %v1110_v34 }
  0x38   :  { %761 = vmatpush.bf16.msrb.mxu0 %v1126_v1 }
  0x39   :  { %732 = vmatpush.bf16.msrb.mxu3 %v1118_v5  ;;  %790 = vmatpush.bf16.msrb.mxu1 %v1134_v16 }
  0x3b   :  { %416 = vmatpush.bf16.msrb.mxu2 %v1109_v38 }
  0x3c   :  { %762 = vmatpush.bf16.msrb.mxu0 %v1125_v3 }
  0x3d   :  { %733 = vmatpush.bf16.msrb.mxu3 %v1117_v7  ;;  %791 = vmatpush.bf16.msrb.mxu1 %v1133_v20 }
  0x3e   :  { %378 = vmatmul.bf16.gmra.mxu2 %v127_v44  ;;  %368 = vmatmul.bf16.gmra.mxu0 %v112_v46 }
  0x3f   :  { %417 = vmatpush.bf16.msrb.mxu2 %v1108_v42  ;;  %407 = vmatmul.bf16.gmra.mxu3 %v1088_v29 }
  0x40   :  { %397 = vmatmul.bf16.gmra.mxu1 %v1086_v32  ;;  %763 = vmatpush.bf16.msrb.mxu0 %v1124_v6 }
  0x41   :  { %734 = vmatpush.bf16.msrb.mxu3 %v1116_v11  ;;  %792 = vmatpush.bf16.msrb.mxu1 %v1132_v23 }
  0x43   :  { %418 = vmatpush.bf16.msrb.mxu2 %v1107_v45 }
  0x44   :  { %764 = vmatpush.bf16.msrb.mxu0 %v1123_v8 }
  0x45   :  { %735 = vmatpush.bf16.msrb.mxu3 %v1115_v14  ;;  %793 = vmatpush.bf16.msrb.mxu1 %v1131_v28 }
  0x47   :  { %419 = vmatpush.bf16.msrb.mxu2 %v1106_v47 }
  0x48   :  { %765 = vmatpush.bf16.msrb.mxu0 %v1122_v12 }
  0x49   :  { %736 = vmatpush.bf16.msrb.mxu3 %v1114_v18  ;;  %794 = vmatpush.bf16.msrb.mxu1 %v1130_v31 }
  0x4b   :  { %420 = vmatpush.bf16.msrb.mxu2 %v1105_v49 }
  0x4c   :  { %766 = vmatpush.bf16.msrb.mxu0 %v1121_v15 }
  0x4d   :  { %737 = vmatpush.bf16.msrb.mxu3 %v1113_v21  ;;  %795 = vmatpush.bf16.msrb.mxu1 %v1129_v36 }
  0x4e   :  { %421 = vmatmul.bf16.vlgmr.msrb.gmra.mxu2 %v140_v52 }
  0x5e   :  { %426 = vmatmul.bf16.gmra.mxu2 %v153_v55 }
  0x6e   :  { %431 = vmatmul.bf16.gmra.mxu2 %v145_v59 }
  0x7e   :  { %436 = vmatmul.bf16.gmra.mxu2 %v154_v61 }
  0xab   :  { %v364_v19 = vpop.f32.mrf.mxu0 }
  0xac   :  { %v365_v27 = vadd.f32 %v1395_v26, %v364_v19 }
  0xad   :  { %v393_v22 = vpop.f32.mrf.mxu1 }
  0xae   :  { %v394_v30 = vadd.f32 %v393_v22, %v365_v27 }
  0xb1   :  { %v1384_v4 = vpop.f32.mrf.mxu2 }
  0xb2   :  { %v403_v60 = vpop.f32.mrf.mxu3  ;;  %v375_v6 = vadd.f32 %v1395_v26, %v1384_v4 }
  0xb3   :  { %v366_v29 = vpop.f32.mrf.mxu0 }
  0xb4   :  { %v367_v34 = vadd.f32 %v1395_v26, %v366_v29  ;;  %v404_v13 = vadd.f32 %v403_v60, %v375_v6 }
  0xb5   :  { %v395_v32 = vpop.f32.mrf.mxu1 }
  0xb6   :  { %v396_v38 = vadd.f32 %v395_v32, %v367_v34 }
  0xb9   :  { %v1386_v10 = vpop.f32.mrf.mxu2 }
  0xba   :  { %v405_v11 = vpop.f32.mrf.mxu3  ;;  %v377_v16 = vadd.f32 %v1395_v26, %v1386_v10 }
  0xbb   :  { %v369_v37 = vpop.f32.mrf.mxu0 }
  0xbc   :  { %v370_v44 = vadd.f32 %v1395_v26, %v369_v37  ;;  %v406_v27 = vadd.f32 %v405_v11, %v377_v16  ;;  %v1424_v11 = vld [vmem:[%s1444_s4] ss:$0 sm:$0xff]  ;;  %s1291_s4 = smov [#allocation8]  }
  0xbd   :  { %v398_v42 = vpop.f32.mrf.mxu1  ;;  %s861_s10 = sshll.u32 %s1291_s4, 4  ;;  %s862_s10 = int_to_ptr.vmem [resolvable:$true] %s861_s10 }
  0xbe   :  { %v399_v48 = vadd.f32 %v398_v42, %v370_v44 }
  0xc1   :  { %v1388_v17 = vpop.f32.mrf.mxu2 }
  0xc3   :  { %v371_v50 = vpop.f32.mrf.mxu0 }
  0xc4   :  { %v372_v53 = vadd.f32 %v1395_v26, %v371_v50 }
  0xc5   :  { %v400_v57 = vpop.f32.mrf.mxu1 }
  0xc6   :  { %v401_v61 = vadd.f32 %v400_v57, %v372_v53 }
  0xc9   :  { %v1390_v24 = vpop.f32.mrf.mxu2 }
  0xca   :  { %v382_v42 = vadd.f32 %v1395_v26, %v1390_v24 }
  0xd1   :  { %v422_v33 = vpop.f32.mrf.mxu2 }
  0xd2   :  { %v423_v35 = vadd.f32 %v422_v33, %v394_v30  ;;  %v408_v33 = vpop.f32.mrf.mxu3 }
  0xd4   :  { %v442_v39 = vmax.f32 %v423_v35, 0.0  ;;  %v380_v35 = vadd.f32 %v1395_v26, %v1388_v17 }
  0xd6   :  { %v450_v43 = vpack.c.bf16 %v442_v39, %v442_v39 }
  0xd8   :  { %v466_v47 = vunpack.c.l.b16 %v450_v43 }
  0xd9   :  { %v424_v40 = vpop.f32.mrf.mxu2 }
  0xda   :  { %v425_v41 = vadd.f32 %v424_v40, %v396_v38  ;;  %v409_v40 = vadd.f32 %v408_v33, %v380_v35 }
  0xdc   :  { %v443_v45 = vmax.f32 %v425_v41, 0.0 }
  0xde   :  { %v451_v46 = vpack.c.bf16 %v443_v45, %v443_v45 }
  0xe0   :  { %v467_v49 = vunpack.c.l.b16 %v451_v46  ;;  %v410_v46 = vpop.f32.mrf.mxu3 }
  0xe1   :  { %v427_v51 = vpop.f32.mrf.mxu2 }
  0xe2   :  { %v474_v52 = vpack.c.b16 %v467_v49, %v466_v47  ;;  %v428_v55 = vadd.f32 %v427_v51, %v399_v48  ;;  %v411_v49 = vadd.f32 %v410_v46, %v382_v42 }
  0xe4   :  { %767 = vmatmul.bf16.vlgmr.msrb.gmra.mxu0 %v474_v52  ;;  %v479_v56 = vshrl.u32 %v474_v52, 16  ;;  %v482_v59 = vshll.u32 %v474_v52, 16  ;;  %v444_v62 = vmax.f32 %v428_v55, 0.0 }
  0xe6   :  { %v481_v58 = vrot.slane %v479_v56, 7  ;;  %v452_v3 = vpack.c.bf16 %v444_v62, %v444_v62  ;;  %v514_v14 = vrot.slane %v482_v59, 1 }
  0xe8   :  { %v484_v63 = vor.u32 %v482_v59, %v481_v58  ;;  %v468_v8 = vunpack.c.l.b16 %v452_v3  ;;  %v515_v21 = vor.u32 %v514_v14, %v479_v56 }
  0xe9   :  { %v429_v0 = vpop.f32.mrf.mxu2 }
  0xea   :  { %v430_v1 = vadd.f32 %v429_v0, %v401_v61  ;;  %v512_v2 = vsel %vm1355_vm2, 0, %v484_v63 }
  0xeb   :  { %738 = vmatmul.bf16.vlgmr.msrb.gmra.mxu3 %v512_v2 }
  0xec   :  { %v445_v5 = vmax.f32 %v430_v1, 0.0 }
  0xee   :  { %v453_v7 = vpack.c.bf16 %v445_v5, %v445_v5 }
  0xf0   :  { %v469_v9 = vunpack.c.l.b16 %v453_v7 }
  0xf1   :  { %v432_v12 = vpop.f32.mrf.mxu2 }
  0xf2   :  { %v475_v15 = vpack.c.b16 %v469_v9, %v468_v8  ;;  %v433_v18 = vadd.f32 %v432_v12, %v404_v13 }
  0xf4   :  { %v486_v19 = vshrl.u32 %v475_v15, 16  ;;  %772 = vmatmul.bf16.gmra.mxu0 %v475_v15  ;;  %v489_v20 = vshll.u32 %v475_v15, 16  ;;  %v446_v4 = vmax.f32 %v433_v18, 0.0  ;;  %v69_v15 = vld [vmem:[#allocation2] sm:$0xff]  }
  0xf6   :  { %v516_v22 = vrot.slane %v489_v20, 1  ;;  %v488_v23 = vrot.slane %v486_v19, 7  ;;  %v454_v10 = vpack.c.bf16 %v446_v4, %v446_v4 }
  0xf8   :  { %v517_v28 = vsel %vm136_vm3, %v515_v21, %v516_v22  ;;  %v491_v29 = vor.u32 %v489_v20, %v488_v23  ;;  %v470_v37 = vunpack.c.l.b16 %v454_v10  ;;  %v518_v44 = vor.u32 %v516_v22, %v486_v19 }
  0xf9   :  { %v434_v30 = vpop.f32.mrf.mxu2  ;;  %796 = vmatmul.bf16.vlgmr.msrb.gmra.mxu1 %v517_v28  ;;  %v817_v20 = vunpack.c.l.bf16 %v69_v15  ;;  %v818_v22 = vunpack.c.h.bf16 %v69_v15 }
  0xfa   :  { %v435_v31 = vadd.f32 %v434_v30, %v406_v27  ;;  %v492_v32 = vsel %vm97_vm0, %v481_v58, %v491_v29  ;;  %v528_v17 = vsel %vm1371_vm5, %v518_v44, 0 }
  0xfb   :  { %743 = vmatmul.bf16.gmra.mxu3 %v492_v32 }
  0xfc   :  { %v447_v34 = vmax.f32 %v435_v31, 0.0 }
  0xfe   :  { %v455_v36 = vpack.c.bf16 %v447_v34, %v447_v34 }
 0x100   :  { %v471_v38 = vunpack.c.l.b16 %v455_v36  ;;  %v71_v36 = vld [vmem:[#allocation2 + $0x8] sm:$0xff]  }
 0x101   :  { %v437_v39 = vpop.f32.mrf.mxu2 }
 0x102   :  { %v476_v41 = vpack.c.b16 %v471_v38, %v470_v37  ;;  %v438_v43 = vadd.f32 %v437_v39, %v409_v40  ;;  %v819_v40 = vunpack.c.l.bf16 %v71_v36 }
 0x104   :  { %777 = vmatmul.bf16.gmra.mxu0 %v476_v41  ;;  %v494_v45 = vshrl.u32 %v476_v41, 16  ;;  %v497_v48 = vshll.u32 %v476_v41, 16  ;;  %v448_v50 = vmax.f32 %v438_v43, 0.0  ;;  %v820_v43 = vunpack.c.h.bf16 %v71_v36 }
 0x106   :  { %v496_v47 = vrot.slane %v494_v45, 7  ;;  %v456_v24 = vpack.c.bf16 %v448_v50, %v448_v50  ;;  %v519_v59 = vrot.slane %v497_v48, 1 }
 0x108   :  { %v499_v51 = vor.u32 %v497_v48, %v496_v47  ;;  %v472_v57 = vunpack.c.l.b16 %v456_v24  ;;  %v520_v63 = vor.u32 %v519_v59, %v494_v45  ;;  %v73_v24 = vld [vmem:[#allocation2 + $0x10] sm:$0xff]  }
 0x109   :  { %v439_v52 = vpop.f32.mrf.mxu2  ;;  %801 = vmatmul.bf16.gmra.mxu1 %v528_v17 }
 0x10a   :  { %v440_v53 = vadd.f32 %v439_v52, %v411_v49  ;;  %v513_v55 = vsel %vm1355_vm2, 0, %v499_v51 }
 0x10b   :  { %748 = vmatmul.bf16.gmra.mxu3 %v513_v55 }
 0x10c   :  { %v449_v26 = vmax.f32 %v440_v53, 0.0 }
 0x10e   :  { %v457_v56 = vpack.c.bf16 %v449_v26, %v449_v26 }
 0x110   :  { %v473_v58 = vunpack.c.l.b16 %v457_v56 }
 0x112   :  { %v477_v60 = vpack.c.b16 %v473_v58, %v472_v57  ;;  %v821_v58 = vunpack.c.l.bf16 %v73_v24 }
 0x114   :  { %v501_v61 = vshrl.u32 %v477_v60, 16  ;;  %782 = vmatmul.bf16.gmra.mxu0 %v477_v60  ;;  %v504_v62 = vshll.u32 %v477_v60, 16  ;;  %v822_v60 = vunpack.c.h.bf16 %v73_v24 }
 0x116   :  { %v521_v0 = vrot.slane %v504_v62, 1  ;;  %v503_v1 = vrot.slane %v501_v61, 7 }
 0x118   :  { %v522_v2 = vsel %vm136_vm3, %v520_v63, %v521_v0  ;;  %v506_v3 = vor.u32 %v504_v62, %v503_v1  ;;  %v523_v5 = vor.u32 %v521_v0, %v501_v61 }
 0x119   :  { %806 = vmatmul.bf16.gmra.mxu1 %v522_v2 }
 0x11a   :  { %v507_v25 = vsel %vm97_vm0, %v496_v47, %v506_v3  ;;  %v529_v6 = vsel %vm1371_vm5, %v523_v5, 0 }
 0x11b   :  { %753 = vmatmul.bf16.gmra.mxu3 %v507_v25 }
 0x129   :  { %811 = vmatmul.bf16.gmra.mxu1 %v529_v6 }
 0x161   :  { %v768_v7 = vpop.f32.mrf.mxu0 }
 0x169   :  { %v770_v9 = vpop.f32.mrf.mxu0 }
 0x16e   :  { %v739_v8 = vpop.f32.mrf.mxu3 }
 0x16f   :  { %v740_v12 = vadd.f32 %v1424_v11, %v739_v8 }
 0x171   :  { %v773_v16 = vpop.f32.mrf.mxu0  ;;  %v769_v19 = vadd.f32 %v768_v7, %v740_v12 }
 0x176   :  { %v741_v13 = vpop.f32.mrf.mxu3  ;;  %v797_v14 = vpop.f32.mrf.mxu1 }
 0x177   :  { %v742_v18 = vadd.f32 %v1424_v11, %v741_v13  ;;  %v798_v54 = vadd.f32 %v797_v14, %v769_v19 }
 0x179   :  { %v771_v21 = vadd.f32 %v770_v9, %v742_v18  ;;  %v825_v4 = vadd.f32 %v817_v20, %v798_v54  ;;  %v775_v31 = vpop.f32.mrf.mxu0  ;;  %v75_v9 = vld [vmem:[#allocation2 + $0x18] sm:$0xff]  }
 0x17a   :  { %v823_v15 = vunpack.c.l.bf16 %v75_v9  ;;  %v824_v19 = vunpack.c.h.bf16 %v75_v9 }
 0x17b   :  { %v833_v30 = vmax.f32 %v825_v4, 0.0 }
 0x17e   :  { %v744_v23 = vpop.f32.mrf.mxu3  ;;  %v799_v27 = vpop.f32.mrf.mxu1 }
 0x17f   :  { %v800_v28 = vadd.f32 %v799_v27, %v771_v21  ;;  %v745_v33 = vadd.f32 %v1424_v11, %v744_v23 }
 0x181   :  { %v826_v29 = vadd.f32 %v818_v22, %v800_v28  ;;  %v774_v38 = vadd.f32 %v773_v16, %v745_v33  ;;  %v778_v41 = vpop.f32.mrf.mxu0 }
 0x183   :  { %v834_v32 = vmax.f32 %v826_v29, 0.0 }
 0x185   :  { %v1140_v10 = vpack.c.bf16 %v834_v32, %v833_v30 }
 0x186   :  { %v746_v34 = vpop.f32.mrf.mxu3  ;;  %v802_v35 = vpop.f32.mrf.mxu1 }
 0x187   :  { %1141 = vst [vmem:[#allocation8] sm:$0xff] %v1140_v10   ;;  %v747_v37 = vadd.f32 %v1424_v11, %v746_v34  ;;  %v803_v39 = vadd.f32 %v802_v35, %v774_v38 }
 0x189   :  { %v776_v42 = vadd.f32 %v775_v31, %v747_v37  ;;  %v827_v46 = vadd.f32 %v819_v40, %v803_v39  ;;  %v780_v55 = vpop.f32.mrf.mxu0 }
 0x18b   :  { %v835_v49 = vmax.f32 %v827_v46, 0.0 }
 0x18e   :  { %v749_v44 = vpop.f32.mrf.mxu3  ;;  %v804_v45 = vpop.f32.mrf.mxu1 }
 0x18f   :  { %v805_v47 = vadd.f32 %v804_v45, %v776_v42  ;;  %v750_v17 = vadd.f32 %v1424_v11, %v749_v44 }
 0x191   :  { %v828_v48 = vadd.f32 %v820_v43, %v805_v47  ;;  %v779_v56 = vadd.f32 %v778_v41, %v750_v17  ;;  %v783_v2 = vpop.f32.mrf.mxu0 }
 0x193   :  { %v836_v50 = vmax.f32 %v828_v48, 0.0 }
 0x195   :  { %v1145_v51 = vpack.c.bf16 %v836_v50, %v835_v49 }
 0x196   :  { %v751_v52 = vpop.f32.mrf.mxu3  ;;  %v807_v53 = vpop.f32.mrf.mxu1 }
 0x197   :  { %1157 = vst [vmem:[#allocation8 + $0x8] sm:$0xff] %v1145_v51   ;;  %v752_v26 = vadd.f32 %v1424_v11, %v751_v52  ;;  %v808_v57 = vadd.f32 %v807_v53, %v779_v56 }
 0x199   :  { %v781_v59 = vadd.f32 %v780_v55, %v752_v26  ;;  %v829_v63 = vadd.f32 %v821_v58, %v808_v57  ;;  %v785_v16 = vpop.f32.mrf.mxu0 }
 0x19b   :  { %v837_v3 = vmax.f32 %v829_v63, 0.0 }
 0x19e   :  { %v754_v61 = vpop.f32.mrf.mxu3  ;;  %v809_v62 = vpop.f32.mrf.mxu1 }
 0x19f   :  { %v810_v0 = vadd.f32 %v809_v62, %v781_v59  ;;  %v755_v5 = vadd.f32 %v1424_v11, %v754_v61 }
 0x1a1   :  { %v830_v1 = vadd.f32 %v822_v60, %v810_v0  ;;  %v784_v13 = vadd.f32 %v783_v2, %v755_v5 }
 0x1a3   :  { %v838_v25 = vmax.f32 %v830_v1, 0.0 }
 0x1a5   :  { %v1150_v6 = vpack.c.bf16 %v838_v25, %v837_v3 }
 0x1a6   :  { %v756_v7 = vpop.f32.mrf.mxu3  ;;  %v812_v8 = vpop.f32.mrf.mxu1 }
 0x1a7   :  { %1158 = vst [vmem:[#allocation8 + $0x10] sm:$0xff] %v1150_v6   ;;  %v757_v12 = vadd.f32 %v1424_v11, %v756_v7  ;;  %v813_v14 = vadd.f32 %v812_v8, %v784_v13 }
 0x1a9   :  { %v786_v18 = vadd.f32 %v785_v16, %v757_v12  ;;  %v831_v20 = vadd.f32 %v823_v15, %v813_v14 }
 0x1ab   :  { %v839_v23 = vmax.f32 %v831_v20, 0.0 }
 0x1ae   :  { %v814_v54 = vpop.f32.mrf.mxu1 }
 0x1af   :  { %v815_v21 = vadd.f32 %v814_v54, %v786_v18 }
 0x1b1   :  { %v832_v22 = vadd.f32 %v824_v19, %v815_v21 }
 0x1b3   :  { %v840_v27 = vmax.f32 %v832_v22, 0.0 }
 0x1b5   :  { %v1155_v4 = vpack.c.bf16 %v840_v27, %v839_v23 }
 0x1b7   :  { %1159 = vst [vmem:[#allocation8 + $0x18] sm:$0xff] %v1155_v4  }
 0x1b8   :  { %869 = dma.vmem_to_hbm [thread:$0]  %s862_s10, 512, %s864_s13, [#allocation4], %s1287_s26, %s1287_s26, %s1288_s27  }
 0x1b9   :  { %1284 = dma.done.wait [#allocation4], 512  }
 0x1ba   :  { %1285 = vsyncadd [#allocation4], 4294966784 }
 0x1bb   :  { %874 = vsyncpa [#allocation3], 1 }
 0x1bc   :  { %875 = vsyncpa [#allocation6], 1 }
 0x1bd   :  { %876 = vsyncpa [#allocation4], 1 }

</bundles_post_ra>
